<compile_context>
chip_gen: v6e
topology: v6e:2x2x1
jax: 0.10.0
libtpu: 0.0.40
codegen_flags: <defaults>
</compile_context>

<pallas_src>
import functools
import math

import jax
import jax.numpy as jnp
from jax.experimental import pallas as pl
from jax.experimental.pallas import tpu as pltpu


def _round_up(n, m):
    return ((n + m - 1) // m) * m


# ---------------------------------------------------------------------------
# Kernels
# ---------------------------------------------------------------------------
def _layernorm_kernel(x_ref, scale_ref, bias_ref, o_ref, *, eps, hidden):
    # x_ref: (tile_rows, H); scale_ref / bias_ref: (1, H) f32 (pre-cast in wrapper).
    x = x_ref[...].astype(jnp.float32)
    mean = jnp.mean(x, axis=-1, keepdims=True)
    diff = x - mean
    # torch.std default is unbiased (Bessel correction: divide by N-1); eps added to std.
    # TODO(synk): hidden == 1 (unbiased std undefined; torch yields NaN) is not supported.
    var = jnp.sum(diff * diff, axis=-1, keepdims=True) * jnp.float32(1.0 / (hidden - 1))
    inv = 1.0 / (jnp.sqrt(var) + jnp.float32(eps))  # exact; per-row cost hidden under DMA
    o_ref[...] = (scale_ref[...] * (diff * inv) + bias_ref[...]).astype(o_ref.dtype)


def _layernorm_fold_kernel(x_ref, scale_ref, bias_ref, seg_ref, o_ref, *, eps, hidden):
    # Lane-dense path for hidden < 128: G = 128//hidden logical rows share one 128-lane row.
    # x_ref: (tile_rows, G*H); seg_ref: (G*H, G) 0/1 selector; scale/bias: (1, G*H) f32.
    x = x_ref[...].astype(jnp.float32)
    seg = seg_ref[...]
    hi = jax.lax.Precision.HIGHEST
    # Segmented (per logical row) reductions on the MXU — idle anyway in this mem-bound kernel.
    mean_g = jnp.dot(x, seg, preferred_element_type=jnp.float32,
                     precision=hi) * jnp.float32(1.0 / hidden)                    # (T, G)
    mean = jax.lax.dot_general(mean_g, seg, (((1,), (1,)), ((), ())),
                               preferred_element_type=jnp.float32, precision=hi)  # (T, G*H)
    diff = x - mean
    var_g = jnp.dot(diff * diff, seg, preferred_element_type=jnp.float32,
                    precision=hi) * jnp.float32(1.0 / (hidden - 1))               # (T, G)
    inv_g = 1.0 / (jnp.sqrt(var_g) + jnp.float32(eps))                            # (T, G)
    inv = jax.lax.dot_general(inv_g, seg, (((1,), (1,)), ((), ())),
                              preferred_element_type=jnp.float32, precision=hi)   # (T, G*H)
    o_ref[...] = (scale_ref[...] * (diff * inv) + bias_ref[...]).astype(o_ref.dtype)


# ---------------------------------------------------------------------------
# Tiling / VMEM heuristics
# ---------------------------------------------------------------------------
def _vmem_budgets():
    """(per-step block budget bytes, scoped vmem_limit bytes), generation-aware."""
    phys = None
    try:
        info = pltpu.get_tpu_info()
        phys = getattr(info, "vmem_capacity_bytes", None)
    except Exception:
        phys = None
    if phys is not None and phys >= (128 << 20):
        # v5e / v6e: 128 MiB physical VMEM -> large blocks amortize the ~0.35us/step cost.
        return 64 << 20, 96 << 20
    # v7x (64 MiB physical) or unknown: stay conservative, leave compiler-scratch headroom.
    return 24 << 20, 46 << 20


def _pick_tile_rows(rows, width, itemsize, vmem_budget_bytes, max_tile_rows=8192):
    """Largest sublane-aligned row tile whose double-buffered IO + f32 temps fit the budget."""
    # Per kernel row: 2x in + 2x out double buffers (itemsize each) + ~3 f32 temporaries.
    bytes_per_row = width * (4 * itemsize + 12)
    row_align = max(8, 32 // itemsize)
    tile = max(row_align, int(vmem_budget_bytes // max(bytes_per_row, 1)))
    tile = min(tile, max_tile_rows, _round_up(rows, row_align))
    tile = max(row_align, (tile // row_align) * row_align)
    if tile >= rows and rows > 2 * row_align:
        # Guarantee >= 2 grid blocks so the "parallel" axis can shard across v7x's two TCs.
        tile = max(row_align, _round_up((rows + 1) // 2, row_align))
    return int(tile)


# ---------------------------------------------------------------------------
# Wrapper
# ---------------------------------------------------------------------------
def layer_norm(x, scale, bias, eps=1e-6, tile_rows=None):
    """LayerNorm over the last axis of x (any leading shape), matching the torch module."""
    orig_shape = x.shape
    hidden = orig_shape[-1]
    rows = int(math.prod(orig_shape[:-1])) if len(orig_shape) > 1 else 1
    itemsize = jnp.dtype(x.dtype).itemsize

    scale_f = scale.reshape(1, hidden).astype(jnp.float32)
    bias_f = bias.reshape(1, hidden).astype(jnp.float32)

    # Lane-dense fold for small hidden: pure reshape in HBM (no data movement), segmented
    # reductions in-kernel. Only taken when it is a free reshape (128 % hidden == 0 and
    # rows % group == 0) so we never add a pad/copy round-trip.
    group = (128 // hidden) if (hidden < 128 and 128 % hidden == 0) else 1
    use_fold = group > 1 and rows % group == 0

    if use_fold:
        width = group * hidden
        rows_k = rows // group
        x2 = x.reshape(rows_k, width)
        scale_k = jnp.tile(scale_f, (1, group))
        bias_k = jnp.tile(bias_f, (1, group))
        seg = (jnp.arange(width, dtype=jnp.int32)[:, None] // hidden
               == jnp.arange(group, dtype=jnp.int32)[None, :]).astype(jnp.float32)
        kernel = functools.partial(_layernorm_fold_kernel, eps=float(eps), hidden=hidden)
        extra_inputs = (seg,)
        extra_specs = [pl.BlockSpec((width, group), lambda i: (0, 0))]  # resident constant
    else:
        width = hidden
        rows_k = rows
        x2 = x.reshape(rows_k, width)
        scale_k, bias_k = scale_f, bias_f
        kernel = functools.partial(_layernorm_kernel, eps=float(eps), hidden=hidden)
        extra_inputs = ()
        extra_specs = []

    block_budget, scoped_cap = _vmem_budgets()
    if tile_rows is None:
        tile_rows = _pick_tile_rows(rows_k, width, itemsize, block_budget)
    # TODO(synk): very large hidden (one aligned row-block > VMEM budget) would need a
    # two-pass hidden-split scheme; not implemented here.

    num_blocks = pl.cdiv(rows_k, tile_rows)

    # Scoped VMEM estimate matches _pick_tile_rows (f32 temps do not scale with itemsize).
    est_bytes = tile_rows * width * (4 * itemsize + 12)
    vmem_limit = int(min(scoped_cap, max(32 << 20, est_bytes + (4 << 20))))

    out = pl.pallas_call(
        kernel,
        out_shape=jax.ShapeDtypeStruct((rows_k, width), x.dtype),
        grid_spec=pltpu.PrefetchScalarGridSpec(
            num_scalar_prefetch=0,
            grid=(num_blocks,),
            in_specs=[
                pl.BlockSpec((tile_rows, width), lambda i: (i, 0)),
                pl.BlockSpec((1, width), lambda i: (0, 0)),   # scale: resident
                pl.BlockSpec((1, width), lambda i: (0, 0)),   # bias: resident
            ] + extra_specs,
            out_specs=pl.BlockSpec((tile_rows, width), lambda i: (i, 0)),
        ),
        compiler_params=pltpu.CompilerParams(
            dimension_semantics=("parallel",),
            vmem_limit_bytes=vmem_limit,
        ),
    )(x2, scale_k, bias_k, *extra_inputs)

    return out.reshape(orig_shape)


def layer_norm_ref(x, scale, bias, eps=1e-6):
    xf = x.astype(jnp.float32)
    mean = jnp.mean(xf, axis=-1, keepdims=True)
    n = xf.shape[-1]
    var = jnp.sum((xf - mean) ** 2, axis=-1, keepdims=True) / (n - 1)
    std = jnp.sqrt(var)
    return (scale.astype(jnp.float32) * (xf - mean) / (std + eps)
            + bias.astype(jnp.float32)).astype(x.dtype)


if __name__ == "__main__":
    # Case 1: module-implied (batch, seq, hidden) with small hidden -> lane-dense fold path.
    batch, seq, hidden = 2, 8, 32
    x = jax.random.normal(jax.random.PRNGKey(0), (batch, seq, hidden), dtype=jnp.float32)
    scale = jnp.ones((hidden,), dtype=jnp.float32)
    bias = jnp.zeros((hidden,), dtype=jnp.float32)
    out = jax.block_until_ready(layer_norm(x, scale, bias, eps=1e-6))
    ref = layer_norm_ref(x, scale, bias, eps=1e-6)
    assert out.shape == x.shape
    assert jnp.allclose(out, ref, atol=2e-3, rtol=2e-3), "mismatch vs reference (case 1)"

    # Case 2: lane-dense hidden, non-divisible row count -> multi-block grid with a partial
    # final block (no wrapper pad/slice).
    x2 = jax.random.normal(jax.random.PRNGKey(1), (3, 37, 256), dtype=jnp.float32)
    s2 = jax.random.normal(jax.random.PRNGKey(2), (256,), dtype=jnp.float32)
    b2 = jax.random.normal(jax.random.PRNGKey(3), (256,), dtype=jnp.float32)
    out2 = jax.block_until_ready(layer_norm(x2, s2, b2, eps=1e-6))
    ref2 = layer_norm_ref(x2, s2, b2, eps=1e-6)
    assert out2.shape == x2.shape
    assert jnp.allclose(out2, ref2, atol=2e-3, rtol=2e-3), "mismatch vs reference (case 2)"

    # Case 3: small hidden whose row count does not fold evenly -> plain path, partial block.
    x3 = jax.random.normal(jax.random.PRNGKey(4), (3, 5, 32), dtype=jnp.float32)
    s3 = jax.random.normal(jax.random.PRNGKey(5), (32,), dtype=jnp.float32)
    b3 = jax.random.normal(jax.random.PRNGKey(6), (32,), dtype=jnp.float32)
    out3 = jax.block_until_ready(layer_norm(x3, s3, b3, eps=1e-6))
    ref3 = layer_norm_ref(x3, s3, b3, eps=1e-6)
    assert out3.shape == x3.shape
    assert jnp.allclose(out3, ref3, atol=2e-3, rtol=2e-3), "mismatch vs reference (case 3)"

    print("KERNEL_OK")
</pallas_src>

<mosaic_0001>
module attributes {stable_mosaic.version = 11 : i64} {
  func.func @_layernorm_fold_kernel(%arg0: i32, %arg1: memref<8x128xf32, #tpu.memory_space<vmem>>, %arg2: memref<1x128xf32, #tpu.memory_space<vmem>>, %arg3: memref<1x128xf32, #tpu.memory_space<vmem>>, %arg4: memref<128x4xf32, #tpu.memory_space<vmem>>, %arg5: memref<8x128xf32, #tpu.memory_space<vmem>>) attributes {dimension_semantics = [#tpu.dimension_semantics<parallel>], iteration_bounds = array<i64: 1>, scalar_prefetch = 0 : i64, scratch_operands = 0 : i64, tpu.core_type = #tpu.core_type<tc>, window_params = [{transform_indices = @transform_0, window_bounds = array<i64: 8, 128>}, {pipeline_mode = #tpu.pipeline_mode<synchronous>, transform_indices = @transform_1, window_bounds = array<i64: 1, 128>}, {pipeline_mode = #tpu.pipeline_mode<synchronous>, transform_indices = @transform_2, window_bounds = array<i64: 1, 128>}, {pipeline_mode = #tpu.pipeline_mode<synchronous>, transform_indices = @transform_3, window_bounds = array<i64: 128, 4>}, {transform_indices = @transform_4, window_bounds = array<i64: 8, 128>}]} {
    %c0 = arith.constant 0 : index
    %c0_0 = arith.constant 0 : index
    %0 = vector.load %arg1[%c0, %c0_0] : memref<8x128xf32, #tpu.memory_space<vmem>>, vector<8x128xf32>
    %c0_1 = arith.constant 0 : index
    %c0_2 = arith.constant 0 : index
    %1 = vector.load %arg4[%c0_1, %c0_2] : memref<128x4xf32, #tpu.memory_space<vmem>>, vector<128x4xf32>
    %cst = arith.constant dense<0.000000e+00> : vector<8x4xf32>
    %2 = tpu.matmul %0, %1, %cst {dimension_numbers = #tpu.dot_dimension_numbers<[1], [0], [0], [1], [0, 0, 1, 1], [], []>, precision = #tpu.contract_precision<fp32>} : vector<8x128xf32>, vector<128x4xf32>, vector<8x4xf32> -> vector<8x4xf32>
    %cst_3 = arith.constant 3.125000e-02 : f32
    %3 = vector.broadcast %cst_3 : f32 to vector<8x4xf32>
    %4 = arith.mulf %2, %3 : vector<8x4xf32>
    %cst_4 = arith.constant dense<0.000000e+00> : vector<8x128xf32>
    %5 = tpu.matmul %4, %1, %cst_4 {dimension_numbers = #tpu.dot_dimension_numbers<[1], [1], [0], [0], [0, 0, 1, 0], [], []>, precision = #tpu.contract_precision<fp32>} : vector<8x4xf32>, vector<128x4xf32>, vector<8x128xf32> -> vector<8x128xf32>
    %6 = arith.subf %0, %5 : vector<8x128xf32>
    %7 = arith.mulf %6, %6 : vector<8x128xf32>
    %cst_5 = arith.constant dense<0.000000e+00> : vector<8x4xf32>
    %8 = tpu.matmul %7, %1, %cst_5 {dimension_numbers = #tpu.dot_dimension_numbers<[1], [0], [0], [1], [0, 0, 1, 1], [], []>, precision = #tpu.contract_precision<fp32>} : vector<8x128xf32>, vector<128x4xf32>, vector<8x4xf32> -> vector<8x4xf32>
    %cst_6 = arith.constant 0.0322580636 : f32
    %9 = vector.broadcast %cst_6 : f32 to vector<8x4xf32>
    %10 = arith.mulf %8, %9 : vector<8x4xf32>
    %11 = math.sqrt %10 : vector<8x4xf32>
    %cst_7 = arith.constant 9.99999997E-7 : f32
    %12 = vector.broadcast %cst_7 : f32 to vector<8x4xf32>
    %13 = arith.addf %11, %12 : vector<8x4xf32>
    %cst_8 = arith.constant 1.000000e+00 : f32
    %14 = vector.broadcast %cst_8 : f32 to vector<8x4xf32>
    %15 = arith.divf %14, %13 : vector<8x4xf32>
    %cst_9 = arith.constant dense<0.000000e+00> : vector<8x128xf32>
    %16 = tpu.matmul %15, %1, %cst_9 {dimension_numbers = #tpu.dot_dimension_numbers<[1], [1], [0], [0], [0, 0, 1, 0], [], []>, precision = #tpu.contract_precision<fp32>} : vector<8x4xf32>, vector<128x4xf32>, vector<8x128xf32> -> vector<8x128xf32>
    %c0_10 = arith.constant 0 : index
    %c0_11 = arith.constant 0 : index
    %17 = vector.load %arg2[%c0_10, %c0_11] : memref<1x128xf32, #tpu.memory_space<vmem>>, vector<1x128xf32>
    %18 = arith.mulf %6, %16 : vector<8x128xf32>
    %19 = vector.broadcast %17 : vector<1x128xf32> to vector<8x128xf32>
    %20 = arith.mulf %19, %18 : vector<8x128xf32>
    %c0_12 = arith.constant 0 : index
    %c0_13 = arith.constant 0 : index
    %21 = vector.load %arg3[%c0_12, %c0_13] : memref<1x128xf32, #tpu.memory_space<vmem>>, vector<1x128xf32>
    %22 = vector.broadcast %21 : vector<1x128xf32> to vector<8x128xf32>
    %23 = arith.addf %20, %22 : vector<8x128xf32>
    %c0_14 = arith.constant 0 : index
    %c0_15 = arith.constant 0 : index
    %24 = vector.load %arg5[%c0_14, %c0_15] : memref<8x128xf32, #tpu.memory_space<vmem>>, vector<8x128xf32>
    tpu.vector_store %arg5[%c0_14, %c0_15], %23 {strides = array<i32>} : memref<8x128xf32, #tpu.memory_space<vmem>>, vector<8x128xf32>,
    return
  }
  func.func @transform_0(%arg0: i32) -> (i32, i32) {
    %c0_i32 = arith.constant 0 : i32
    %c0_i32_0 = arith.constant 0 : i32
    return %arg0, %c0_i32 : i32, i32
  }
  func.func @transform_1(%arg0: i32) -> (i32, i32) {
    %c0_i32 = arith.constant 0 : i32
    %c0_i32_0 = arith.constant 0 : i32
    %c0_i32_1 = arith.constant 0 : i32
    return %c0_i32, %c0_i32_0 : i32, i32
  }
  func.func @transform_2(%arg0: i32) -> (i32, i32) {
    %c0_i32 = arith.constant 0 : i32
    %c0_i32_0 = arith.constant 0 : i32
    %c0_i32_1 = arith.constant 0 : i32
    return %c0_i32, %c0_i32_0 : i32, i32
  }
  func.func @transform_3(%arg0: i32) -> (i32, i32) {
    %c0_i32 = arith.constant 0 : i32
    %c0_i32_0 = arith.constant 0 : i32
    %c0_i32_1 = arith.constant 0 : i32
    return %c0_i32, %c0_i32_0 : i32, i32
  }
  func.func @transform_4(%arg0: i32) -> (i32, i32) {
    %c0_i32 = arith.constant 0 : i32
    %c0_i32_0 = arith.constant 0 : i32
    return %arg0, %c0_i32 : i32, i32
  }
}

</mosaic_0001>

<bundles_post_ra>
// kernel: tpu_custom_call.1
= control target key start
LH: loop header
LB: loop body
LE: loop exit
PB: predicated region body
PF: predicated region fallthrough
CT: control target
= control target key end

     0   :  { %9 = vsyncpa [#allocation3], 0  ;;  %v5552_v2 = vmov 0.0   ;;  %vm3985_vm0 = vmmov 0   ;;  %vm677_vm1 = vcmask 31744   ;;  %s5432_s0 = inlined_call_operand.vmem [shape: f32[4,128], index: 0, kind: input, shape index: {}]   ;;  %s5433_s1 = inlined_call_operand.vmem [shape: f32[1,128], index: 1, kind: input, shape index: {}]   ;;  %s5434_s2 = inlined_call_operand.vmem [shape: f32[1,128], index: 2, kind: input, shape index: {}]   ;;  %s5435_s3 = inlined_call_operand.vmem [shape: f32[128,4], index: 3, kind: input, shape index: {}]   ;;  %s5436_s4 = inlined_call_operand.hbm [shape: f32[4,128], index: 4, kind: output, shape index: {}]  }
   0x1   :  { %v4017_v0 = vld [vmem:[%s5435_s3 + $0x78] sm:$0xff]  ;;  %v4022_v1 = vld [vmem:[%s5435_s3 + $0x70] sm:$0xff]  ;;  %3112 = vmatprep.subr.mxu0 %v5552_v2  ;;  %v4034_v5 = vld [vmem:[%s5435_s3 + $0x68] sm:$0xff]  ;;  %3147 = vmatprep.subr.mxu1 %v5552_v2 }
   0x2   :  { %v4026_v3 = vand.u32 4294901760, %v4017_v0  ;;  %v4029_v4 = vand.u32 4294901760, %v4022_v1  ;;  %v4039_v6 = vld [vmem:[%s5435_s3 + $0x60] sm:$0xff]  ;;  %v4045_v7 = vld [vmem:[%s5435_s3 + $0x58] sm:$0xff]  ;;  %v4048_v8 = vand.u32 4294901760, %v4034_v5  ;;  %v4059_v11 = vld [vmem:[%s5435_s3 + $0x50] sm:$0xff]  ;;  %3144 = vmatprep.mubr.msk.f32.mxu0 %vm3985_vm0, %v5552_v2  ;;  %3179 = vmatprep.mubr.msk.f32.mxu1 %vm3985_vm0, %v5552_v2 }
   0x3   :  { %5573 = vst [vmem:[#allocation7_spill] sm:$0xff] %v4039_v6  ;;  %5574 = vst [vmem:[#allocation8_spill] sm:$0xff] %v4045_v7  ;;  %v4051_v9 = vand.u32 4294901760, %v4039_v6  ;;  %v4054_v10 = vand.u32 4294901760, %v4045_v7  ;;  %v4064_v12 = vld [vmem:[%s5435_s3 + $0x48] sm:$0xff]  ;;  %v4069_v13 = vld [vmem:[%s5435_s3 + $0x40] sm:$0xff] }
   0x4   :  { %5571 = vst [vmem:[#allocation5_spill] sm:$0xff] %v4026_v3  ;;  %5572 = vst [vmem:[#allocation6_spill] sm:$0xff] %v4029_v4  ;;  %3113 = vmatpush3.msra.mxu0 %v4026_v3  ;;  %v4078_v14 = vsub.f32 %v4017_v0, %v4026_v3  ;;  %v4081_v15 = vand.u32 4294901760, %v4059_v11  ;;  %v4085_v16 = vsub.f32 %v4022_v1, %v4029_v4  ;;  %v4088_v17 = vand.u32 4294901760, %v4064_v12  ;;  %v4093_v18 = vld [vmem:[%s5435_s3 + $0x38] sm:$0xff]  ;;  %v4131_v28 = vld [vmem:[%s5435_s3 + $0x30] sm:$0xff] }
   0x5   :  { %5575 = vst [vmem:[#allocation9_spill] sm:$0xff] %v4048_v8  ;;  %5576 = vst [vmem:[#allocation10_spill] sm:$0xff] %v4051_v9  ;;  %3114 = vmatprep.subr.mxu0 %v5552_v2  ;;  %v4098_v19 = vsub.f32 %v4034_v5, %v4048_v8  ;;  %v4102_v20 = vsub.f32 %v4039_v6, %v4051_v9  ;;  %v4112_v23 = vand.u32 4294901760, %v4069_v13  ;;  %v4126_v27 = vand.u32 4294901760, %v4093_v18  ;;  %v4158_v36 = vld [vmem:[%s5435_s3 + $0x28] sm:$0xff]  ;;  %v4177_v42 = vld [vmem:[%s5435_s3 + $0x20] sm:$0xff] }
   0x6   :  { %5577 = vst [vmem:[#allocation11_spill] sm:$0xff] %v4054_v10  ;;  %5578 = vst [vmem:[#allocation12_spill] sm:$0xff] %v4059_v11  ;;  %3115 = vmatpush3.msra.mxu0 %v4029_v4  ;;  %v4106_v21 = vand.u32 4294901760, %v4078_v14  ;;  %v4109_v22 = vand.u32 4294901760, %v4085_v16  ;;  %v4116_v24 = vsub.f32 %v4045_v7, %v4054_v10  ;;  %v4135_v29 = vsub.f32 %v4059_v11, %v4081_v15  ;;  %v4203_v49 = vld [vmem:[%s5435_s3 + $0x18] sm:$0xff]  ;;  %v18_v50 = vld [vmem:[%s5432_s0] sm:$0xff] }
   0x7   :  { %5579 = vst [vmem:[#allocation13_spill] sm:$0xff] %v4064_v12  ;;  %5580 = vst [vmem:[#allocation14_spill] sm:$0xff] %v4069_v13  ;;  %3116 = vmatprep.subr.mxu0 %v5552_v2  ;;  %v4120_v25 = vand.u32 4294901760, %v4098_v19  ;;  %v4123_v26 = vand.u32 4294901760, %v4102_v20  ;;  %v4147_v33 = vsub.f32 %v4064_v12, %v4088_v17  ;;  %v4168_v40 = vand.u32 4294901760, %v4131_v28  ;;  %v4232_v57 = vld [vmem:[%s5435_s3 + $0x10] sm:$0xff] }
   0x8   :  { %5581 = vst [vmem:[#allocation15_spill] sm:$0xff] %v4078_v14  ;;  %5582 = vst [vmem:[#allocation16_spill] sm:$0xff] %v4081_v15  ;;  %3117 = vmatpush3.msra.mxu0 %v4048_v8  ;;  %v130_v30 = vsub.f32 %v4078_v14, %v4106_v21  ;;  %v137_v31 = vsub.f32 %v4085_v16, %v4109_v22  ;;  %v4143_v32 = vand.u32 4294901760, %v4116_v24  ;;  %v4153_v35 = vand.u32 4294901760, %v4135_v29  ;;  %v4254_v63 = vld [vmem:[%s5435_s3 + $0x8] sm:$0xff] }
   0x9   :  { %5583 = vst [vmem:[#allocation17_spill] sm:$0xff] %v4085_v16  ;;  %5584 = vst [vmem:[#allocation18_spill] sm:$0xff] %v4088_v17  ;;  %3118 = vmatprep.subr.mxu0 %v5552_v2  ;;  %v144_v34 = vsub.f32 %v4098_v19, %v4120_v25  ;;  %v151_v39 = vsub.f32 %v4102_v20, %v4123_v26  ;;  %v4172_v41 = vand.u32 4294901760, %v4147_v33  ;;  %v4190_v46 = vand.u32 4294901760, %v4158_v36 }
   0xa   :  { %5585 = vst [vmem:[#allocation19_spill] sm:$0xff] %v4093_v18  ;;  %5586 = vst [vmem:[#allocation20_spill] sm:$0xff] %v4098_v19  ;;  %3119 = vmatpush3.msra.mxu0 %v4051_v9  ;;  %v4161_v37 = vand.u32 4294901760, %v130_v30  ;;  %v4163_v38 = vand.u32 4294901760, %v137_v31  ;;  %v4181_v43 = vsub.f32 %v4069_v13, %v4112_v23  ;;  %v158_v45 = vsub.f32 %v4116_v24, %v4143_v32 }
   0xb   :  { %5587 = vst [vmem:[#allocation21_spill] sm:$0xff] %v4102_v20  ;;  %5588 = vst [vmem:[#allocation22_spill] sm:$0xff] %v4106_v21  ;;  %3120 = vmatprep.subr.mxu0 %v5552_v2  ;;  %v4185_v44 = vand.u32 4294901760, %v144_v34  ;;  %v4194_v47 = vsub.f32 %v4093_v18, %v4126_v27  ;;  %v165_v48 = vsub.f32 %v4135_v29, %v4153_v35  ;;  %v4210_v51 = vand.u32 4294901760, %v151_v39  ;;  %v4269_v39 = vld [vmem:[%s5435_s3] sm:$0xff] }
   0xc   :  { %5589 = vst [vmem:[#allocation23_spill] sm:$0xff] %v4109_v22  ;;  %5590 = vst [vmem:[#allocation24_spill] sm:$0xff] %v4112_v23  ;;  %3121 = vmatpush3.msra.mxu0 %v4054_v10  ;;  %3148 = vmatpush3.msra.mxu1 %v4161_v37  ;;  %v4213_v52 = vand.u32 4294901760, %v4177_v42  ;;  %v4216_v53 = vand.u32 4294901760, %v4181_v43  ;;  %v4220_v54 = vsub.f32 %v4131_v28, %v4168_v40  ;;  %v4236_v58 = vand.u32 4294901760, %v158_v45 }
   0xd   :  { %5591 = vst [vmem:[#allocation25_spill] sm:$0xff] %v4116_v24  ;;  %5592 = vst [vmem:[#allocation26_spill] sm:$0xff] %v4120_v25  ;;  %3122 = vmatprep.subr.mxu0 %v5552_v2  ;;  %3149 = vmatprep.subr.mxu1 %v5552_v2  ;;  %v172_v55 = vsub.f32 %v4147_v33, %v4172_v41  ;;  %v4227_v56 = vand.u32 4294901760, %v4194_v47  ;;  %v4239_v59 = vand.u32 4294901760, %v4203_v49  ;;  %v4245_v61 = vand.u32 4294901760, %v18_v50 }
   0xe   :  { %5593 = vst [vmem:[#allocation27_spill] sm:$0xff] %v4123_v26  ;;  %5594 = vst [vmem:[#allocation28_spill] sm:$0xff] %v4126_v27  ;;  %3123 = vmatpush3.msra.mxu0 %v4081_v15  ;;  %3150 = vmatpush3.msra.mxu1 %v4163_v38  ;;  %v4243_v60 = vsub.f32 %v4158_v36, %v4190_v46  ;;  %v4249_v62 = vand.u32 4294901760, %v165_v48  ;;  %v179_v30 = vsub.f32 %v4181_v43, %v4216_v53 }
   0xf   :  { %5595 = vst [vmem:[#allocation29_spill] sm:$0xff] %v4131_v28  ;;  %5596 = vst [vmem:[#allocation30_spill] sm:$0xff] %v4135_v29  ;;  %3124 = vmatprep.subr.mxu0 %v5552_v2  ;;  %3151 = vmatprep.subr.mxu1 %v5552_v2  ;;  %v4261_v31 = vand.u32 4294901760, %v4232_v57  ;;  %v4264_v34 = vand.u32 4294901760, %v4220_v54  ;;  %v4273_v45 = vsub.f32 %v4177_v42, %v4213_v52  ;;  %v4277_v48 = vand.u32 4294901760, %v172_v55 }
  0x10   :  { %5597 = vst [vmem:[#allocation31_spill] sm:$0xff] %v4143_v32  ;;  %5598 = vst [vmem:[#allocation32_spill] sm:$0xff] %v4147_v33  ;;  %3125 = vmatpush3.msra.mxu0 %v4088_v17  ;;  %3152 = vmatpush3.msra.mxu1 %v4185_v44  ;;  %v4294_v55 = vsub.f32 %v4203_v49, %v4239_v59 }
  0x11   :  { %5599 = vst [vmem:[#allocation33_spill] sm:$0xff] %v4153_v35  ;;  %5600 = vst [vmem:[#allocation34_spill] sm:$0xff] %v4158_v36  ;;  %3126 = vmatprep.subr.mxu0 %v5552_v2  ;;  %3153 = vmatprep.subr.mxu1 %v5552_v2  ;;  %v4308_v36 = vand.u32 4294901760, %v4273_v45 }
  0x12   :  { %5601 = vst [vmem:[#allocation35_spill] sm:$0xff] %v4161_v37  ;;  %5602 = vst [vmem:[#allocation36_spill] sm:$0xff] %v4163_v38  ;;  %3127 = vmatpush3.msra.mxu0 %v4112_v23  ;;  %3154 = vmatpush3.msra.mxu1 %v4210_v51  ;;  %v4287_v38 = vand.u32 4294901760, %v4243_v60  ;;  %v4290_v37 = vsub.f32 %v18_v50, %v4245_v61  ;;  %v193_v50 = vsub.f32 %v4220_v54, %v4264_v34 }
  0x13   :  { %5603 = vst [vmem:[#allocation37_spill] sm:$0xff] %v4168_v40  ;;  %5604 = vst [vmem:[#allocation38_spill] sm:$0xff] %v4172_v41  ;;  %3128 = vmatprep.subr.mxu0 %v5552_v2  ;;  %3155 = vmatprep.subr.mxu1 %v5552_v2  ;;  %v4324_v18 = vand.u32 4294901760, %v4294_v55 }
  0x14   :  { %5605 = vst [vmem:[#allocation39_spill] sm:$0xff] %v4177_v42  ;;  %5606 = vst [vmem:[#allocation40_spill] sm:$0xff] %v4181_v43  ;;  %3129 = vmatpush3.msra.mxu0 %v4126_v27  ;;  %3156 = vmatpush3.msra.mxu1 %v4236_v58  ;;  %v4299_v42 = vand.u32 4294901760, %v4269_v39 }
  0x15   :  { %5607 = vst [vmem:[#allocation41_spill] sm:$0xff] %v4185_v44  ;;  %5608 = vst [vmem:[#allocation42_spill] sm:$0xff] %v4190_v46  ;;  %v4284_v44 = vand.u32 4294901760, %v4254_v63  ;;  %3130 = vmatprep.subr.mxu0 %v5552_v2  ;;  %3157 = vmatprep.subr.mxu1 %v5552_v2  ;;  %v214_v12 = vsub.f32 %v4294_v55, %v4324_v18 }
  0x16   :  { %5609 = vst [vmem:[#allocation43_spill] sm:$0xff] %v4194_v47  ;;  %5610 = vst [vmem:[#allocation44_spill] sm:$0xff] %v4203_v49  ;;  %3131 = vmatpush3.msra.mxu0 %v4168_v40  ;;  %3158 = vmatpush3.msra.mxu1 %v4249_v62  ;;  %v4312_v49 = vsub.f32 %v4232_v57, %v4261_v31 }
  0x17   :  { %5611 = vst [vmem:[#allocation45_spill] sm:$0xff] %v4210_v51  ;;  %5612 = vst [vmem:[#allocation46_spill] sm:$0xff] %v4213_v52  ;;  %v186_v51 = vsub.f32 %v4194_v47, %v4227_v56  ;;  %3132 = vmatprep.subr.mxu0 %v5552_v2  ;;  %3159 = vmatprep.subr.mxu1 %v5552_v2  ;;  %v4374_v7 = vand.u32 4294901760, %v214_v12 }
  0x18   :  { %5613 = vst [vmem:[#allocation47_spill] sm:$0xff] %v4216_v53  ;;  %5614 = vst [vmem:[#allocation48_spill] sm:$0xff] %v4220_v54  ;;  %3133 = vmatpush3.msra.mxu0 %v4190_v46  ;;  %3160 = vmatpush3.msra.mxu1 %v4277_v48 }
  0x19   :  { %5615 = vst [vmem:[#allocation49_spill] sm:$0xff] %v4227_v56  ;;  %5616 = vst [vmem:[#allocation50_spill] sm:$0xff] %v4232_v57  ;;  %v4316_v28 = vand.u32 4294901760, %v186_v51  ;;  %v4328_v57 = vsub.f32 %v4254_v63, %v4284_v44  ;;  %3134 = vmatprep.subr.mxu0 %v5552_v2  ;;  %3161 = vmatprep.subr.mxu1 %v5552_v2  ;;  %v4334_v51 = vand.u32 4294901760, %v193_v50 }
  0x1a   :  { %5617 = vst [vmem:[#allocation51_spill] sm:$0xff] %v4236_v58  ;;  %5618 = vst [vmem:[#allocation52_spill] sm:$0xff] %v4239_v59  ;;  %v4303_v58 = vand.u32 4294901760, %v179_v30  ;;  %v200_v30 = vsub.f32 %v4243_v60, %v4287_v38  ;;  %3135 = vmatpush3.msra.mxu0 %v4213_v52 }
  0x1b   :  { %5619 = vst [vmem:[#allocation53_spill] sm:$0xff] %v4243_v60  ;;  %5620 = vst [vmem:[#allocation54_spill] sm:$0xff] %v4249_v62  ;;  %v207_v62 = vsub.f32 %v4273_v45, %v4308_v36  ;;  %3136 = vmatprep.subr.mxu0 %v5552_v2 }
  0x1c   :  { %5621 = vst [vmem:[#allocation55_spill] sm:$0xff] %v4254_v63  ;;  %5622 = vst [vmem:[#allocation56_spill] sm:$0xff] %v4261_v31  ;;  %3162 = vmatpush3.msra.mxu1 %v4303_v58  ;;  %v4343_v63 = vsub.f32 %v4269_v39, %v4299_v42  ;;  %3137 = vmatpush3.msra.mxu0 %v4239_v59  ;;  %v4349_v50 = vand.u32 4294901760, %v200_v30 }
  0x1d   :  { %5623 = vst [vmem:[#allocation57_spill] sm:$0xff] %v4264_v34  ;;  %5624 = vst [vmem:[#allocation58_spill] sm:$0xff] %v4269_v39  ;;  %3163 = vmatprep.subr.mxu1 %v5552_v2  ;;  %v4357_v39 = vand.u32 4294901760, %v4328_v57  ;;  %3138 = vmatprep.subr.mxu0 %v5552_v2  ;;  %v4363_v30 = vand.u32 4294901760, %v207_v62 }
  0x1e   :  { %5625 = vst [vmem:[#allocation59_spill] sm:$0xff] %v4273_v45  ;;  %5626 = vst [vmem:[#allocation60_spill] sm:$0xff] %v4277_v48  ;;  %v4339_v48 = vand.u32 4294901760, %v4312_v49  ;;  %3164 = vmatpush3.msra.mxu1 %v4316_v28  ;;  %3139 = vmatpush3.msra.mxu0 %v4261_v31 }
  0x1f   :  { %5627 = vst [vmem:[#allocation61_spill] sm:$0xff] %v4284_v44  ;;  %5628 = vst [vmem:[#allocation62_spill] sm:$0xff] %v4287_v38  ;;  %3165 = vmatprep.subr.mxu1 %v5552_v2  ;;  %3140 = vmatprep.subr.mxu0 %v5552_v2  ;;  %v228_v62 = vsub.f32 %v4328_v57, %v4357_v39 }
  0x20   :  { %5629 = vst [vmem:[#allocation63_spill] sm:$0xff] %v4294_v55  ;;  %5630 = vst [vmem:[#allocation64_spill] sm:$0xff] %v4299_v42  ;;  %3166 = vmatpush3.msra.mxu1 %v4334_v51  ;;  %3141 = vmatpush3.msra.mxu0 %v4284_v44 }
  0x21   :  { %5631 = vst [vmem:[#allocation65_spill] sm:$0xff] %v4303_v58  ;;  %5632 = vst [vmem:[#allocation66_spill] sm:$0xff] %v4308_v36  ;;  %v5641_v58 = vand.u32 4294901760, %v4290_v37  ;;  %3167 = vmatprep.subr.mxu1 %v5552_v2  ;;  %3142 = vmatprep.subr.mxu0 %v5552_v2  ;;  %v4389_v12 = vand.u32 4294901760, %v228_v62  ;;  %v721_v62 = vsel %vm677_vm1, %v4034_v5, 0 }
  0x22   :  { %5633 = vst [vmem:[#allocation67_spill] sm:$0xff] %v4312_v49  ;;  %5634 = vst [vmem:[#allocation68_spill] sm:$0xff] %v4316_v28  ;;  %v221_v28 = vsub.f32 %v4312_v49, %v4339_v48  ;;  %3168 = vmatpush3.msra.mxu1 %v4349_v50  ;;  %3143 = vmatpush3.msra.mxu0 %v4299_v42 }
  0x23   :  { %5635 = vst [vmem:[#allocation69_spill] sm:$0xff] %v4324_v18  ;;  %5636 = vst [vmem:[#allocation70_spill] sm:$0xff] %v4328_v57  ;;  %v119_v13 = vsub.f32 %v4290_v37, %v5641_v58  ;;  %v4368_v58 = vand.u32 4294901760, %v4343_v63  ;;  %3169 = vmatprep.subr.mxu1 %v5552_v2  ;;  %3182 = vmatprep.subr.mxu0 %v5552_v2 }
  0x24   :  { %5637 = vst [vmem:[#allocation71_spill] sm:$0xff] %v4334_v51  ;;  %5638 = vst [vmem:[#allocation72_spill] sm:$0xff] %v4339_v48  ;;  %3170 = vmatpush3.msra.mxu1 %v4363_v30  ;;  %v4382_v51 = vand.u32 4294901760, %v221_v28 }
  0x25   :  { %5639 = vst [vmem:[#allocation73_spill] sm:$0xff] %v4343_v63  ;;  %5640 = vst [vmem:[#allocation74_spill] sm:$0xff] %v4349_v50  ;;  %v120_v11 = vand.u32 4294901760, %v119_v13  ;;  %v235_v6 = vsub.f32 %v4343_v63, %v4368_v58  ;;  %3171 = vmatprep.subr.mxu1 %v5552_v2 }
  0x26   :  { %5642 = vst [vmem:[#allocation75_spill] sm:$0xff] %v4357_v39  ;;  %5643 = vst [vmem:[#allocation76_spill] sm:$0xff] %v4363_v30  ;;  %3172 = vmatpush3.msra.mxu1 %v4374_v7 }
  0x27   :  { %5644 = vst [vmem:[#allocation77_spill] sm:$0xff] %v4368_v58  ;;  %5645 = vst [vmem:[#allocation78_spill] sm:$0xff] %v4374_v7  ;;  %3145 = vmatmul.mubr.f32.vlgmr.msra.gmra.mxu0 %v120_v11  ;;  %3173 = vmatprep.subr.mxu1 %v5552_v2  ;;  %v4395_v13 = vand.u32 4294901760, %v235_v6  ;;  %v5649_v6 = vand.u32 4294901760, %v4290_v37  ;;  %v727_v11 = vsel %vm677_vm1, %v4017_v0, 0 }
  0x28   :  { %5646 = vst [vmem:[#allocation79_spill] sm:$0xff] %v4382_v51  ;;  %5647 = vst [vmem:[#allocation80_spill] sm:$0xff] %v4389_v12  ;;  %3183 = vmatpush3.msra.mxu0 %v4078_v14  ;;  %3174 = vmatpush3.msra.mxu1 %v4382_v51  ;;  %v4543_v28 = vand.u32 4294901760, %v727_v11 }
  0x29   :  { %3184 = vmatprep.subr.mxu0 %v5552_v2  ;;  %5648 = vst [vmem:[#allocation81_spill] sm:$0xff] %v4395_v13  ;;  %3175 = vmatprep.subr.mxu1 %v5552_v2 }
  0x2a   :  { %3185 = vmatpush3.msra.mxu0 %v4085_v16  ;;  %3176 = vmatpush3.msra.mxu1 %v4389_v12  ;;  %v4559_v0 = vsub.f32 %v727_v11, %v4543_v28 }
  0x2b   :  { %3186 = vmatprep.subr.mxu0 %v5552_v2  ;;  %3177 = vmatprep.subr.mxu1 %v5552_v2 }
  0x2c   :  { %3187 = vmatpush3.msra.mxu0 %v4098_v19  ;;  %3178 = vmatpush3.msra.mxu1 %v4395_v13 }
  0x2d   :  { %3188 = vmatprep.subr.mxu0 %v5552_v2  ;;  %3180 = vmatmul.mubr.f32.vlgmr.msra.gmra.mxu1 %v4245_v61 }
  0x2e   :  { %3189 = vmatpush3.msra.mxu0 %v4102_v20  ;;  %3217 = vmatprep.subr.mxu1 %v5552_v2 }
  0x2f   :  { %3190 = vmatprep.subr.mxu0 %v5552_v2  ;;  %3218 = vmatpush3.msra.mxu1 %v4026_v3 }
  0x30   :  { %3191 = vmatpush3.msra.mxu0 %v4116_v24  ;;  %3219 = vmatprep.subr.mxu1 %v5552_v2 }
  0x31   :  { %3192 = vmatprep.subr.mxu0 %v5552_v2  ;;  %3220 = vmatpush3.msra.mxu1 %v4029_v4 }
  0x32   :  { %3193 = vmatpush3.msra.mxu0 %v4135_v29  ;;  %3221 = vmatprep.subr.mxu1 %v5552_v2 }
  0x33   :  { %3194 = vmatprep.subr.mxu0 %v5552_v2  ;;  %3222 = vmatpush3.msra.mxu1 %v4048_v8 }
  0x34   :  { %3195 = vmatpush3.msra.mxu0 %v4147_v33  ;;  %3223 = vmatprep.subr.mxu1 %v5552_v2 }
  0x35   :  { %3196 = vmatprep.subr.mxu0 %v5552_v2  ;;  %3224 = vmatpush3.msra.mxu1 %v4051_v9 }
  0x36   :  { %3197 = vmatpush3.msra.mxu0 %v4181_v43  ;;  %3225 = vmatprep.subr.mxu1 %v5552_v2 }
  0x37   :  { %3198 = vmatprep.subr.mxu0 %v5552_v2  ;;  %3226 = vmatpush3.msra.mxu1 %v4054_v10 }
  0x38   :  { %3199 = vmatpush3.msra.mxu0 %v4194_v47  ;;  %3227 = vmatprep.subr.mxu1 %v5552_v2 }
  0x39   :  { %3200 = vmatprep.subr.mxu0 %v5552_v2  ;;  %3228 = vmatpush3.msra.mxu1 %v4081_v15 }
  0x3a   :  { %3201 = vmatpush3.msra.mxu0 %v4220_v54  ;;  %3229 = vmatprep.subr.mxu1 %v5552_v2 }
  0x3b   :  { %3202 = vmatprep.subr.mxu0 %v5552_v2  ;;  %3230 = vmatpush3.msra.mxu1 %v4088_v17 }
  0x3c   :  { %3203 = vmatpush3.msra.mxu0 %v4243_v60  ;;  %3231 = vmatprep.subr.mxu1 %v5552_v2 }
  0x3d   :  { %3204 = vmatprep.subr.mxu0 %v5552_v2  ;;  %3232 = vmatpush3.msra.mxu1 %v4112_v23 }
  0x3e   :  { %3205 = vmatpush3.msra.mxu0 %v4273_v45  ;;  %3233 = vmatprep.subr.mxu1 %v5552_v2 }
  0x3f   :  { %3206 = vmatprep.subr.mxu0 %v5552_v2  ;;  %3234 = vmatpush3.msra.mxu1 %v4126_v27 }
  0x40   :  { %3207 = vmatpush3.msra.mxu0 %v4294_v55  ;;  %3235 = vmatprep.subr.mxu1 %v5552_v2 }
  0x41   :  { %3208 = vmatprep.subr.mxu0 %v5552_v2  ;;  %3236 = vmatpush3.msra.mxu1 %v4168_v40 }
  0x42   :  { %3209 = vmatpush3.msra.mxu0 %v4312_v49  ;;  %3237 = vmatprep.subr.mxu1 %v5552_v2 }
  0x43   :  { %3210 = vmatprep.subr.mxu0 %v5552_v2  ;;  %3238 = vmatpush3.msra.mxu1 %v4190_v46 }
  0x44   :  { %3211 = vmatpush3.msra.mxu0 %v4328_v57  ;;  %3239 = vmatprep.subr.mxu1 %v5552_v2 }
  0x45   :  { %3212 = vmatprep.subr.mxu0 %v5552_v2  ;;  %3214 = vmatprep.mubr.msk.f32.mxu0 %vm3985_vm0, %v5552_v2 }
  0x46   :  { %3213 = vmatpush3.msra.mxu0 %v4343_v63  ;;  %3240 = vmatpush3.msra.mxu1 %v4213_v52 }
  0x47   :  { %3215 = vmatmul.mubr.f32.vlgmr.msra.gmra.mxu0 %v4290_v37  ;;  %3241 = vmatprep.subr.mxu1 %v5552_v2  ;;  %v724_v37 = vsel %vm677_vm1, %v4022_v1, 0 }
  0x48   :  { %3252 = vmatprep.subr.mxu0 %v5552_v2  ;;  %3242 = vmatpush3.msra.mxu1 %v4239_v59 }
  0x49   :  { %3253 = vmatpush3.msra.mxu0 %v4106_v21  ;;  %3243 = vmatprep.subr.mxu1 %v5552_v2 }
  0x4a   :  { %3254 = vmatprep.subr.mxu0 %v5552_v2  ;;  %3244 = vmatpush3.msra.mxu1 %v4261_v31 }
  0x4b   :  { %3255 = vmatpush3.msra.mxu0 %v4109_v22  ;;  %3245 = vmatprep.subr.mxu1 %v5552_v2 }
  0x4c   :  { %3256 = vmatprep.subr.mxu0 %v5552_v2  ;;  %3246 = vmatpush3.msra.mxu1 %v4284_v44 }
  0x4d   :  { %3257 = vmatpush3.msra.mxu0 %v4120_v25  ;;  %3247 = vmatprep.subr.mxu1 %v5552_v2 }
  0x4e   :  { %3258 = vmatprep.subr.mxu0 %v5552_v2  ;;  %3248 = vmatpush3.msra.mxu1 %v4299_v42 }
  0x4f   :  { %3249 = vmatprep.mubr.msk.f32.mxu1 %vm3985_vm0, %v5552_v2  ;;  %3259 = vmatpush3.msra.mxu0 %v4123_v26 }
  0x50   :  { %3250 = vmatmul.mubr.f32.vlgmr.msra.gmra.mxu1 %v5649_v6  ;;  %3260 = vmatprep.subr.mxu0 %v5552_v2  ;;  %v5650_v6 = vld [vmem:[#allocation7_spill] sm:$0xff] }
  0x51   :  { %3287 = vmatprep.subr.mxu1 %v5552_v2  ;;  %3261 = vmatpush3.msra.mxu0 %v4143_v32 }
  0x52   :  { %3288 = vmatpush3.msra.mxu1 %v4026_v3  ;;  %3262 = vmatprep.subr.mxu0 %v5552_v2 }
  0x53   :  { %3289 = vmatprep.subr.mxu1 %v5552_v2  ;;  %3263 = vmatpush3.msra.mxu0 %v4153_v35 }
  0x54   :  { %3290 = vmatpush3.msra.mxu1 %v4029_v4  ;;  %3264 = vmatprep.subr.mxu0 %v5552_v2 }
  0x55   :  { %3291 = vmatprep.subr.mxu1 %v5552_v2  ;;  %3265 = vmatpush3.msra.mxu0 %v4172_v41 }
  0x56   :  { %3292 = vmatpush3.msra.mxu1 %v4048_v8  ;;  %3266 = vmatprep.subr.mxu0 %v5552_v2 }
  0x57   :  { %3293 = vmatprep.subr.mxu1 %v5552_v2  ;;  %3267 = vmatpush3.msra.mxu0 %v4216_v53 }
  0x58   :  { %3294 = vmatpush3.msra.mxu1 %v4051_v9  ;;  %3268 = vmatprep.subr.mxu0 %v5552_v2 }
  0x59   :  { %3295 = vmatprep.subr.mxu1 %v5552_v2  ;;  %3269 = vmatpush3.msra.mxu0 %v4227_v56 }
  0x5a   :  { %3296 = vmatpush3.msra.mxu1 %v4054_v10  ;;  %3270 = vmatprep.subr.mxu0 %v5552_v2 }
  0x5b   :  { %3297 = vmatprep.subr.mxu1 %v5552_v2  ;;  %3271 = vmatpush3.msra.mxu0 %v4264_v34 }
  0x5c   :  { %3298 = vmatpush3.msra.mxu1 %v4081_v15  ;;  %3272 = vmatprep.subr.mxu0 %v5552_v2 }
  0x5d   :  { %3299 = vmatprep.subr.mxu1 %v5552_v2  ;;  %3273 = vmatpush3.msra.mxu0 %v4287_v38 }
  0x5e   :  { %3300 = vmatpush3.msra.mxu1 %v4088_v17  ;;  %3274 = vmatprep.subr.mxu0 %v5552_v2 }
  0x5f   :  { %3301 = vmatprep.subr.mxu1 %v5552_v2  ;;  %3275 = vmatpush3.msra.mxu0 %v4308_v36 }
  0x60   :  { %3302 = vmatpush3.msra.mxu1 %v4112_v23  ;;  %3276 = vmatprep.subr.mxu0 %v5552_v2 }
  0x61   :  { %3303 = vmatprep.subr.mxu1 %v5552_v2  ;;  %3277 = vmatpush3.msra.mxu0 %v4324_v18 }
  0x62   :  { %3304 = vmatpush3.msra.mxu1 %v4126_v27  ;;  %3278 = vmatprep.subr.mxu0 %v5552_v2 }
  0x63   :  { %3305 = vmatprep.subr.mxu1 %v5552_v2  ;;  %3279 = vmatpush3.msra.mxu0 %v4339_v48  ;;  %v4554_v48 = vand.u32 4294901760, %v721_v62 }
  0x64   :  { %3306 = vmatpush3.msra.mxu1 %v4168_v40  ;;  %3280 = vmatprep.subr.mxu0 %v5552_v2 }
  0x65   :  { %3307 = vmatprep.subr.mxu1 %v5552_v2  ;;  %3281 = vmatpush3.msra.mxu0 %v4357_v39  ;;  %v4552_v39 = vand.u32 4294901760, %v724_v37 }
  0x66   :  { %3308 = vmatpush3.msra.mxu1 %v4190_v46  ;;  %3282 = vmatprep.subr.mxu0 %v5552_v2 }
  0x67   :  { %3309 = vmatprep.subr.mxu1 %v5552_v2  ;;  %3283 = vmatpush3.msra.mxu0 %v4368_v58  ;;  %v718_v58 = vsel %vm677_vm1, %v5650_v6, 0  ;;  %v4564_v5 = vsub.f32 %v724_v37, %v4552_v39  ;;  %v4568_v6 = vsub.f32 %v721_v62, %v4554_v48 }
  0x68   :  { %3284 = vmatprep.mubr.msk.f32.mxu0 %vm3985_vm0, %v5552_v2  ;;  %3310 = vmatpush3.msra.mxu1 %v4213_v52  ;;  %v4561_v1 = vand.u32 4294901760, %v718_v58 }
  0x69   :  { %3285 = vmatmul.mubr.f32.vlgmr.msra.gmra.mxu0 %v4245_v61  ;;  %3311 = vmatprep.subr.mxu1 %v5552_v2  ;;  %v4577_v11 = vand.u32 4294901760, %v4564_v5  ;;  %v4582_v18 = vand.u32 4294901760, %v4568_v6 }
  0x6a   :  { %3319 = vmatprep.mubr.msk.f32.mxu1 %vm3985_vm0, %v5552_v2  ;;  %3312 = vmatpush3.msra.mxu1 %v4239_v59  ;;  %v4585_v62 = vsub.f32 %v718_v58, %v4561_v1 }
  0x6b   :  { %3322 = vmatprep.subr.mxu0 %v5552_v2  ;;  %3313 = vmatprep.subr.mxu1 %v5552_v2  ;;  %5652 = vst [vmem:[#allocation82_spill] sm:$0xff] %v4577_v11  ;;  %5653 = vst [vmem:[#allocation83_spill] sm:$0xff] %v4582_v18  ;;  %v831_v36 = vsub.f32 %v4564_v5, %v4577_v11  ;;  %v838_v56 = vsub.f32 %v4568_v6, %v4582_v18 }
  0x6c   :  { %3354 = vmatprep.mubr.msk.f32.mxu0 %vm3985_vm0, %v5552_v2  ;;  %3314 = vmatpush3.msra.mxu1 %v4261_v31  ;;  %v4599_v53 = vand.u32 4294901760, %v4585_v62 }
  0x6d   :  { %3315 = vmatprep.subr.mxu1 %v5552_v2  ;;  %3323 = vmatpush3.xpose.msra.mxu0 %v4543_v28  ;;  %v4594_v34 = vand.u32 4294901760, %v831_v36  ;;  %v4605_v58 = vand.u32 4294901760, %v838_v56 }
  0x6e   :  { %3316 = vmatpush3.msra.mxu1 %v4284_v44  ;;  %3324 = vmatprep.subr.mxu0 %v5552_v2  ;;  %5656 = vst [vmem:[#allocation86_spill] sm:$0xff] %v4599_v53  ;;  %v845_v36 = vsub.f32 %v4585_v62, %v4599_v53 }
  0x6f   :  { %3317 = vmatprep.subr.mxu1 %v5552_v2  ;;  %5655 = vst [vmem:[#allocation85_spill] sm:$0xff] %v4594_v34  ;;  %5657 = vst [vmem:[#allocation87_spill] sm:$0xff] %v4605_v58 }
  0x70   :  { %3318 = vmatpush3.msra.mxu1 %v4299_v42  ;;  %v4617_v35 = vand.u32 4294901760, %v845_v36  ;;  %v5682_v42 = vld [vmem:[#allocation44_spill] sm:$0xff] }
  0x71   :  { %3320 = vmatmul.mubr.f32.vlgmr.msra.gmra.mxu1 %v4245_v61  ;;  %3357 = vmatprep.subr.mxu1 %v5552_v2  ;;  %v4573_v61 = vand.u32 4294901760, %v4559_v0  ;;  %v691_v44 = vsel %vm677_vm1, %v5682_v42, 0 }
  0x72   :  { %3389 = vmatprep.mubr.msk.f32.mxu1 %vm3985_vm0, %v5552_v2  ;;  %3325 = vmatpush3.xpose.msra.mxu0 %v4552_v39 }
  0x73   :  { %5651 = vst [vmem:[#allocation7_spill] sm:$0xff] %v4573_v61  ;;  %v824_v37 = vsub.f32 %v4559_v0, %v4573_v61  ;;  %3326 = vmatprep.subr.mxu0 %v5552_v2 }
  0x75   :  { %v4590_v38 = vand.u32 4294901760, %v824_v37  ;;  %v5658_v37 = vld [vmem:[#allocation8_spill] sm:$0xff] }
  0x76   :  { %3327 = vmatpush3.xpose.msra.mxu0 %v4554_v48  ;;  %5659 = vst [vmem:[#allocation8_spill] sm:$0xff] %v4617_v35 }
  0x77   :  { %5654 = vst [vmem:[#allocation84_spill] sm:$0xff] %v4590_v38  ;;  %3358 = vmatpush3.xpose.msra.mxu1 %v4590_v38  ;;  %3328 = vmatprep.subr.mxu0 %v5552_v2  ;;  %v715_v38 = vsel %vm677_vm1, %v5658_v37, 0 }
  0x78   :  { %3359 = vmatprep.subr.mxu1 %v5552_v2  ;;  %v4613_v41 = vand.u32 4294901760, %v715_v38 }
  0x7a   :  { %3329 = vmatpush3.xpose.msra.mxu0 %v4561_v1  ;;  %v4620_v56 = vsub.f32 %v715_v38, %v4613_v41 }
  0x7b   :  { %3360 = vmatpush3.xpose.msra.mxu1 %v4594_v34  ;;  %3330 = vmatprep.subr.mxu0 %v5552_v2  ;;  %v5660_v34 = vld [vmem:[#allocation12_spill] sm:$0xff] }
  0x7c   :  { %3361 = vmatprep.subr.mxu1 %v5552_v2  ;;  %v712_v32 = vsel %vm677_vm1, %v5660_v34, 0  ;;  %v4627_v37 = vand.u32 4294901760, %v4620_v56  ;;  %v5662_v34 = vld [vmem:[#allocation13_spill] sm:$0xff] }
  0x7d   :  { %v4629_v26 = vand.u32 4294901760, %v712_v32 }
  0x7e   :  { %3331 = vmatpush3.xpose.msra.mxu0 %v4613_v41  ;;  %5661 = vst [vmem:[#allocation12_spill] sm:$0xff] %v4627_v37  ;;  %v852_v38 = vsub.f32 %v4620_v56, %v4627_v37 }
  0x7f   :  { %3362 = vmatpush3.xpose.msra.mxu1 %v4605_v58  ;;  %3332 = vmatprep.subr.mxu0 %v5552_v2  ;;  %v4636_v36 = vsub.f32 %v712_v32, %v4629_v26  ;;  %v709_v58 = vsel %vm677_vm1, %v5662_v34, 0  ;;  %v5665_v34 = vld [vmem:[#allocation14_spill] sm:$0xff] }
  0x80   :  { %3363 = vmatprep.subr.mxu1 %v5552_v2  ;;  %v4642_v25 = vand.u32 4294901760, %v852_v38  ;;  %v4647_v21 = vand.u32 4294901760, %v709_v58  ;;  %v706_v38 = vsel %vm677_vm1, %v5665_v34, 0  ;;  %v5668_v34 = vld [vmem:[#allocation19_spill] sm:$0xff] }
  0x81   :  { %v4645_v22 = vand.u32 4294901760, %v4636_v36  ;;  %v4665_v49 = vand.u32 4294901760, %v706_v38 }
  0x82   :  { %3333 = vmatpush3.xpose.msra.mxu0 %v4629_v26  ;;  %5663 = vst [vmem:[#allocation13_spill] sm:$0xff] %v4642_v25 }
  0x83   :  { %3364 = vmatpush3.xpose.msra.mxu1 %v4617_v35  ;;  %5664 = vst [vmem:[#allocation88_spill] sm:$0xff] %v4645_v22  ;;  %3334 = vmatprep.subr.mxu0 %v5552_v2  ;;  %v859_v32 = vsub.f32 %v4636_v36, %v4645_v22  ;;  %v4654_v35 = vsub.f32 %v709_v58, %v4647_v21 }
  0x84   :  { %3365 = vmatprep.subr.mxu1 %v5552_v2 }
  0x85   :  { %v4660_v63 = vand.u32 4294901760, %v859_v32  ;;  %v4663_v57 = vand.u32 4294901760, %v4654_v35  ;;  %v703_v32 = vsel %vm677_vm1, %v5668_v34, 0  ;;  %v5671_v34 = vld [vmem:[#allocation29_spill] sm:$0xff] }
  0x86   :  { %3335 = vmatpush3.xpose.msra.mxu0 %v4647_v21  ;;  %v4683_v60 = vand.u32 4294901760, %v703_v32  ;;  %v700_v54 = vsel %vm677_vm1, %v5671_v34, 0 }
  0x87   :  { %3366 = vmatpush3.xpose.msra.mxu1 %v4642_v25  ;;  %5666 = vst [vmem:[#allocation14_spill] sm:$0xff] %v4660_v63  ;;  %5667 = vst [vmem:[#allocation89_spill] sm:$0xff] %v4663_v57  ;;  %3336 = vmatprep.subr.mxu0 %v5552_v2  ;;  %v866_v58 = vsub.f32 %v4654_v35, %v4663_v57  ;;  %v4672_v25 = vsub.f32 %v706_v38, %v4665_v49  ;;  %v4697_v43 = vand.u32 4294901760, %v700_v54 }
  0x88   :  { %3367 = vmatprep.subr.mxu1 %v5552_v2 }
  0x89   :  { %v4678_v55 = vand.u32 4294901760, %v866_v58  ;;  %v4681_v45 = vand.u32 4294901760, %v4672_v25  ;;  %v5672_v58 = vld [vmem:[#allocation34_spill] sm:$0xff] }
  0x8a   :  { %3337 = vmatpush3.xpose.msra.mxu0 %v4665_v49  ;;  %v697_v47 = vsel %vm677_vm1, %v5672_v58, 0  ;;  %v4713_v58 = vsub.f32 %v700_v54, %v4697_v43 }
  0x8b   :  { %3368 = vmatpush3.xpose.msra.mxu1 %v4660_v63  ;;  %5669 = vst [vmem:[#allocation19_spill] sm:$0xff] %v4678_v55  ;;  %5670 = vst [vmem:[#allocation90_spill] sm:$0xff] %v4681_v45  ;;  %3338 = vmatprep.subr.mxu0 %v5552_v2  ;;  %v873_v38 = vsub.f32 %v4672_v25, %v4681_v45  ;;  %v4690_v63 = vsub.f32 %v703_v32, %v4683_v60  ;;  %v4700_v33 = vand.u32 4294901760, %v697_v47 }
  0x8c   :  { %3369 = vmatprep.subr.mxu1 %v5552_v2  ;;  %v4726_v19 = vand.u32 4294901760, %v4713_v58 }
  0x8d   :  { %v4704_v24 = vand.u32 4294901760, %v873_v38  ;;  %v4707_v32 = vand.u32 4294901760, %v4690_v63  ;;  %v4716_v20 = vsub.f32 %v697_v47, %v4700_v33 }
  0x8e   :  { %3339 = vmatpush3.xpose.msra.mxu0 %v4683_v60  ;;  %v887_v54 = vsub.f32 %v4713_v58, %v4726_v19 }
  0x8f   :  { %3370 = vmatpush3.xpose.msra.mxu1 %v4678_v55  ;;  %v5673_v55 = vld [vmem:[#allocation39_spill] sm:$0xff]  ;;  %5674 = vst [vmem:[#allocation29_spill] sm:$0xff] %v4704_v24  ;;  %5675 = vst [vmem:[#allocation34_spill] sm:$0xff] %v4707_v32  ;;  %3340 = vmatprep.subr.mxu0 %v5552_v2  ;;  %v4729_v16 = vand.u32 4294901760, %v4716_v20 }
  0x90   :  { %3371 = vmatprep.subr.mxu1 %v5552_v2  ;;  %v694_v29 = vsel %vm677_vm1, %v5673_v55, 0  ;;  %v880_v55 = vsub.f32 %v4690_v63, %v4707_v32  ;;  %5676 = vst [vmem:[#allocation39_spill] sm:$0xff] %v4726_v19  ;;  %v4744_v14 = vand.u32 4294901760, %v887_v54  ;;  %v4757_v54 = vand.u32 4294901760, %v691_v44 }
  0x91   :  { %v4710_v34 = vand.u32 4294901760, %v694_v29  ;;  %5677 = vst [vmem:[#allocation91_spill] sm:$0xff] %v4729_v16 }
  0x92   :  { %3341 = vmatpush3.xpose.msra.mxu0 %v4697_v43  ;;  %v4732_v47 = vand.u32 4294901760, %v880_v55  ;;  %5680 = vst [vmem:[#allocation94_spill] sm:$0xff] %v4744_v14 }
  0x93   :  { %3372 = vmatpush3.xpose.msra.mxu1 %v4704_v24  ;;  %v4722_v38 = vsub.f32 %v694_v29, %v4710_v34  ;;  %3342 = vmatprep.subr.mxu0 %v5552_v2  ;;  %v894_v29 = vsub.f32 %v4716_v20, %v4729_v16 }
  0x94   :  { %3373 = vmatprep.subr.mxu1 %v5552_v2  ;;  %5678 = vst [vmem:[#allocation92_spill] sm:$0xff] %v4732_v47 }
  0x95   :  { %v4741_v24 = vand.u32 4294901760, %v4722_v38  ;;  %v4749_v55 = vand.u32 4294901760, %v894_v29  ;;  %v4764_v29 = vsub.f32 %v691_v44, %v4757_v54 }
  0x96   :  { %3343 = vmatpush3.xpose.msra.mxu0 %v4700_v33 }
  0x97   :  { %3374 = vmatpush3.xpose.msra.mxu1 %v4732_v47  ;;  %5679 = vst [vmem:[#allocation93_spill] sm:$0xff] %v4741_v24  ;;  %3344 = vmatprep.subr.mxu0 %v5552_v2  ;;  %5681 = vst [vmem:[#allocation95_spill] sm:$0xff] %v4749_v55  ;;  %v901_v47 = vsub.f32 %v4722_v38, %v4741_v24  ;;  %v4771_v42 = vand.u32 4294901760, %v4764_v29 }
  0x98   :  { %3375 = vmatprep.subr.mxu1 %v5552_v2 }
  0x99   :  { %v4761_v31 = vand.u32 4294901760, %v901_v47  ;;  %v908_v44 = vsub.f32 %v4764_v29, %v4771_v42 }
  0x9a   :  { %3345 = vmatpush3.xpose.msra.mxu0 %v4710_v34 }
  0x9b   :  { %3376 = vmatpush3.xpose.msra.mxu1 %v4744_v14  ;;  %3346 = vmatprep.subr.mxu0 %v5552_v2  ;;  %5683 = vst [vmem:[#allocation44_spill] sm:$0xff] %v4761_v31  ;;  %v5684_v14 = vld [vmem:[#allocation50_spill] sm:$0xff]  ;;  %v4786_v52 = vand.u32 4294901760, %v908_v44 }
  0x9c   :  { %3377 = vmatprep.subr.mxu1 %v5552_v2  ;;  %v688_v59 = vsel %vm677_vm1, %v5684_v14, 0  ;;  %5685 = vst [vmem:[#allocation50_spill] sm:$0xff] %v4771_v42  ;;  %v5687_v14 = vld [vmem:[#allocation55_spill] sm:$0xff] }
  0x9d   :  { %v4773_v13 = vand.u32 4294901760, %v688_v59  ;;  %5688 = vst [vmem:[#allocation55_spill] sm:$0xff] %v4786_v52 }
  0x9e   :  { %3347 = vmatpush3.xpose.msra.mxu0 %v4757_v54 }
  0x9f   :  { %3378 = vmatpush3.xpose.msra.mxu1 %v4749_v55  ;;  %3348 = vmatprep.subr.mxu0 %v5552_v2  ;;  %v4780_v47 = vsub.f32 %v688_v59, %v4773_v13  ;;  %v685_v55 = vsel %vm677_vm1, %v5687_v14, 0  ;;  %v5691_v14 = vld [vmem:[#allocation58_spill] sm:$0xff] }
  0xa0   :  { %3379 = vmatprep.subr.mxu1 %v5552_v2  ;;  %v4791_v46 = vand.u32 4294901760, %v685_v55  ;;  %v682_v44 = vsel %vm677_vm1, %v5691_v14, 0 }
  0xa1   :  { %5686 = vst [vmem:[#allocation96_spill] sm:$0xff] %v4780_v47  ;;  %v4789_v12 = vand.u32 4294901760, %v4780_v47  ;;  %v4809_v7 = vand.u32 4294901760, %v682_v44 }
  0xa2   :  { %3349 = vmatpush3.xpose.msra.mxu0 %v4773_v13 }
  0xa3   :  { %3380 = vmatpush3.xpose.msra.mxu1 %v4761_v31  ;;  %5689 = vst [vmem:[#allocation97_spill] sm:$0xff] %v4789_v12  ;;  %3350 = vmatprep.subr.mxu0 %v5552_v2  ;;  %v915_v59 = vsub.f32 %v4780_v47, %v4789_v12  ;;  %v4798_v31 = vsub.f32 %v685_v55, %v4791_v46 }
  0xa4   :  { %3381 = vmatprep.subr.mxu1 %v5552_v2 }
  0xa5   :  { %5690 = vst [vmem:[#allocation98_spill] sm:$0xff] %v4798_v31  ;;  %v4804_v51 = vand.u32 4294901760, %v915_v59  ;;  %v4807_v40 = vand.u32 4294901760, %v4798_v31 }
  0xa6   :  { %3351 = vmatpush3.xpose.msra.mxu0 %v4791_v46 }
  0xa7   :  { %3382 = vmatpush3.xpose.msra.mxu1 %v4786_v52  ;;  %5692 = vst [vmem:[#allocation58_spill] sm:$0xff] %v4804_v51  ;;  %5693 = vst [vmem:[#allocation99_spill] sm:$0xff] %v4807_v40  ;;  %3352 = vmatprep.subr.mxu0 %v5552_v2  ;;  %v922_v55 = vsub.f32 %v4798_v31, %v4807_v40  ;;  %v4816_v52 = vsub.f32 %v682_v44, %v4809_v7 }
  0xa8   :  { %3383 = vmatprep.subr.mxu1 %v5552_v2 }
  0xa9   :  { %5694 = vst [vmem:[#allocation100_spill] sm:$0xff] %v4816_v52  ;;  %v4820_v59 = vand.u32 4294901760, %v922_v55  ;;  %v4823_v14 = vand.u32 4294901760, %v4816_v52 }
  0xaa   :  { %3353 = vmatpush3.xpose.msra.mxu0 %v4809_v7 }
  0xab   :  { %3384 = vmatpush3.xpose.msra.mxu1 %v4804_v51  ;;  %5695 = vst [vmem:[#allocation101_spill] sm:$0xff] %v4820_v59  ;;  %5696 = vst [vmem:[#allocation102_spill] sm:$0xff] %v4823_v14  ;;  %3392 = vmatprep.subr.mxu0 %v5552_v2  ;;  %v929_v51 = vsub.f32 %v4816_v52, %v4823_v14 }
  0xac   :  { %3385 = vmatprep.subr.mxu1 %v5552_v2 }
  0xad   :  { %v4830_v44 = vand.u32 4294901760, %v929_v51 }
  0xaf   :  { %3386 = vmatpush3.xpose.msra.mxu1 %v4820_v59  ;;  %5697 = vst [vmem:[#allocation103_spill] sm:$0xff] %v4830_v44 }
  0xb0   :  { %3387 = vmatprep.subr.mxu1 %v5552_v2 }
  0xb3   :  { %3388 = vmatpush3.xpose.msra.mxu1 %v4830_v44 }
  0xb4   :  { %3427 = vmatprep.subr.mxu1 %v5552_v2 }
  0xe7   :  { %v122_v55 = vpop.f32.mrf.mxu0 }
  0xe9   :  { %v3146_v27 = vpop.f32.mrf.mxu0 }
  0xea   :  { %v5703_v27 = vld [vmem:[#allocation36_spill] sm:$0xff] }
  0xed   :  { %v273_v30 = vpop.f32.mrf.mxu1 }
  0xee   :  { %v274_v9 = vadd.f32 %v273_v30, %v122_v55  ;;  %v5706_v30 = vld [vmem:[#allocation45_spill] sm:$0xff] }
  0xef   :  { %v3181_v23 = vpop.f32.mrf.mxu1  ;;  %v5711_v55 = vld [vmem:[#allocation9_spill] sm:$0xff] }
 0x107   :  { %v377_v50 = vpop.f32.mrf.mxu0 }
 0x108   :  { %v378_v4 = vadd.f32 %v377_v50, %v274_v9  ;;  %v5700_v9 = vld [vmem:[#allocation97_spill] sm:$0xff] }
 0x109   :  { %v3216_v17 = vpop.f32.mrf.mxu0  ;;  %v5705_v50 = vld [vmem:[#allocation41_spill] sm:$0xff] }
 0x10a   :  { %v5702_v17 = vld [vmem:[#allocation35_spill] sm:$0xff] }
 0x110   :  { %v466_v15 = vpop.f32.mrf.mxu1 }
 0x111   :  { %v467_v3 = vadd.f32 %v466_v15, %v378_v4  ;;  %v5701_v15 = vld [vmem:[#allocation99_spill] sm:$0xff] }
 0x112   :  { %v3251_v10 = vpop.f32.mrf.mxu1 }
 0x113   :  { %v5698_v10 = vmov 0.0  }
 0x129   :  { %v585_v59 = vpop.f32.mrf.mxu0 }
 0x12a   :  { %v586_v14 = vadd.f32 %v585_v59, %v467_v3  ;;  %v5708_v59 = vld [vmem:[#allocation51_spill] sm:$0xff] }
 0x12b   :  { %v3286_v8 = vpop.f32.mrf.mxu0 }
 0x12c   :  { %v5699_v8 = vld [vmem:[#allocation50_spill] sm:$0xff] }
 0x131   :  { %v672_v51 = vpop.f32.mrf.mxu1 }
 0x132   :  { %v673_v40 = vadd.f32 %v672_v51, %v586_v14  ;;  %v5709_v14 = vld [vmem:[#allocation6_spill] sm:$0xff] }
 0x133   :  { %v3321_v12 = vpop.f32.mrf.mxu1  ;;  %v5713_v51 = vld [vmem:[#allocation10_spill] sm:$0xff] }
 0x134   :  { %v676_v44 = vmul.f32 0.03125, %v673_v40  ;;  %v5704_v40 = vld [vmem:[#allocation102_spill] sm:$0xff]  ;;  %v5707_v12 = vld [vmem:[#allocation5_spill] sm:$0xff] }
 0x136   :  { %v679_v2 = vsel %vm677_vm1, %v676_v44, 0  ;;  %v5710_v44 = vld [vmem:[#allocation54_spill] sm:$0xff] }
 0x137   :  { %v4835_v42 = vand.u32 4294901760, %v679_v2 }
 0x139   :  { %v4838_v23 = vsub.f32 %v679_v2, %v4835_v42  ;;  %3390 = vmatmul.mubr.f32.vlgmr.msra.gmra.mxu1 %v4835_v42 }
 0x13a   :  { %3428 = vmatpush3.xpose.msra.mxu1 %v4543_v28  ;;  %3459 = vmatprep.mubr.msk.f32.mxu1 %vm3985_vm0, %v5698_v10 }
 0x13b   :  { %v812_v3 = vand.u32 4294901760, %v4838_v23  ;;  %3429 = vmatprep.subr.mxu1 %v5698_v10 }
 0x13d   :  { %v813_v4 = vsub.f32 %v4838_v23, %v812_v3 }
 0x13e   :  { %3430 = vmatpush3.xpose.msra.mxu1 %v4552_v39 }
 0x13f   :  { %3431 = vmatprep.subr.mxu1 %v5698_v10  ;;  %v814_v2 = vand.u32 4294901760, %v813_v4  ;;  %v5716_v4 = vld [vmem:[#allocation68_spill] sm:$0xff] }
 0x141   :  { %3355 = vmatmul.mubr.f32.vlgmr.msra.gmra.mxu0 %v814_v2  ;;  %v5717_v2 = vld [vmem:[#allocation16_spill] sm:$0xff] }
 0x142   :  { %3393 = vmatpush3.xpose.msra.mxu0 %v4559_v0  ;;  %3432 = vmatpush3.xpose.msra.mxu1 %v4554_v48 }
 0x143   :  { %3394 = vmatprep.subr.mxu0 %v5698_v10  ;;  %3433 = vmatprep.subr.mxu1 %v5698_v10 }
 0x144   :  { %3424 = vmatprep.mubr.msk.f32.mxu0 %vm3985_vm0, %v5698_v10 }
 0x146   :  { %3395 = vmatpush3.xpose.msra.mxu0 %v4564_v5  ;;  %3434 = vmatpush3.xpose.msra.mxu1 %v4561_v1 }
 0x147   :  { %3396 = vmatprep.subr.mxu0 %v5698_v10  ;;  %3435 = vmatprep.subr.mxu1 %v5698_v10 }
 0x14a   :  { %3397 = vmatpush3.xpose.msra.mxu0 %v4568_v6  ;;  %3436 = vmatpush3.xpose.msra.mxu1 %v4613_v41 }
 0x14b   :  { %3398 = vmatprep.subr.mxu0 %v5698_v10  ;;  %3437 = vmatprep.subr.mxu1 %v5698_v10 }
 0x14e   :  { %3399 = vmatpush3.xpose.msra.mxu0 %v4585_v62  ;;  %3438 = vmatpush3.xpose.msra.mxu1 %v4629_v26 }
 0x14f   :  { %3400 = vmatprep.subr.mxu0 %v5698_v10  ;;  %3439 = vmatprep.subr.mxu1 %v5698_v10 }
 0x152   :  { %3401 = vmatpush3.xpose.msra.mxu0 %v4620_v56  ;;  %3440 = vmatpush3.xpose.msra.mxu1 %v4647_v21 }
 0x153   :  { %3402 = vmatprep.subr.mxu0 %v5698_v10  ;;  %3441 = vmatprep.subr.mxu1 %v5698_v10 }
 0x156   :  { %3403 = vmatpush3.xpose.msra.mxu0 %v4636_v36  ;;  %3442 = vmatpush3.xpose.msra.mxu1 %v4665_v49 }
 0x157   :  { %3404 = vmatprep.subr.mxu0 %v5698_v10  ;;  %3443 = vmatprep.subr.mxu1 %v5698_v10 }
 0x15a   :  { %3405 = vmatpush3.xpose.msra.mxu0 %v4654_v35  ;;  %3444 = vmatpush3.xpose.msra.mxu1 %v4683_v60 }
 0x15b   :  { %3406 = vmatprep.subr.mxu0 %v5698_v10  ;;  %3445 = vmatprep.subr.mxu1 %v5698_v10 }
 0x15e   :  { %3407 = vmatpush3.xpose.msra.mxu0 %v4672_v25  ;;  %3446 = vmatpush3.xpose.msra.mxu1 %v4697_v43 }
 0x15f   :  { %3408 = vmatprep.subr.mxu0 %v5698_v10  ;;  %3447 = vmatprep.subr.mxu1 %v5698_v10 }
 0x162   :  { %3409 = vmatpush3.xpose.msra.mxu0 %v4690_v63  ;;  %3448 = vmatpush3.xpose.msra.mxu1 %v4700_v33 }
 0x163   :  { %3410 = vmatprep.subr.mxu0 %v5698_v10  ;;  %3449 = vmatprep.subr.mxu1 %v5698_v10 }
 0x166   :  { %3411 = vmatpush3.xpose.msra.mxu0 %v4713_v58  ;;  %3450 = vmatpush3.xpose.msra.mxu1 %v4710_v34 }
 0x167   :  { %3412 = vmatprep.subr.mxu0 %v5698_v10  ;;  %3451 = vmatprep.subr.mxu1 %v5698_v10 }
 0x16a   :  { %3413 = vmatpush3.xpose.msra.mxu0 %v4716_v20  ;;  %3452 = vmatpush3.xpose.msra.mxu1 %v4757_v54 }
 0x16b   :  { %3414 = vmatprep.subr.mxu0 %v5698_v10  ;;  %3453 = vmatprep.subr.mxu1 %v5698_v10 }
 0x16e   :  { %3415 = vmatpush3.xpose.msra.mxu0 %v4722_v38  ;;  %3454 = vmatpush3.xpose.msra.mxu1 %v4773_v13 }
 0x16f   :  { %3416 = vmatprep.subr.mxu0 %v5698_v10  ;;  %3455 = vmatprep.subr.mxu1 %v5698_v10 }
 0x172   :  { %3417 = vmatpush3.xpose.msra.mxu0 %v4764_v29  ;;  %3456 = vmatpush3.xpose.msra.mxu1 %v4791_v46 }
 0x173   :  { %3418 = vmatprep.subr.mxu0 %v5698_v10  ;;  %3457 = vmatprep.subr.mxu1 %v5698_v10 }
 0x176   :  { %3419 = vmatpush3.xpose.msra.mxu0 %v4780_v47  ;;  %3458 = vmatpush3.xpose.msra.mxu1 %v4809_v7  ;;  %v3961_v47 = vld [vmem:[%s5432_s0] sm:$0xff] }
 0x177   :  { %3420 = vmatprep.subr.mxu0 %v5698_v10  ;;  %3497 = vmatprep.subr.mxu1 %v5698_v10 }
 0x179   :  { %3460 = vmatmul.mubr.f32.vlgmr.msra.gmra.mxu1 %v812_v3  ;;  %v5715_v3 = vld [vmem:[#allocation11_spill] sm:$0xff] }
 0x17a   :  { %3421 = vmatpush3.xpose.msra.mxu0 %v4798_v31  ;;  %3498 = vmatpush3.xpose.msra.mxu1 %v4543_v28 }
 0x17b   :  { %3422 = vmatprep.subr.mxu0 %v5698_v10  ;;  %3499 = vmatprep.subr.mxu1 %v5698_v10 }
 0x17c   :  { %3529 = vmatprep.mubr.msk.f32.mxu1 %vm3985_vm0, %v5698_v10 }
 0x17e   :  { %3423 = vmatpush3.xpose.msra.mxu0 %v4816_v52  ;;  %3500 = vmatpush3.xpose.msra.mxu1 %v4552_v39 }
 0x17f   :  { %3462 = vmatprep.subr.mxu0 %v5698_v10  ;;  %3501 = vmatprep.subr.mxu1 %v5698_v10 }
 0x181   :  { %3425 = vmatmul.mubr.f32.vlgmr.msra.gmra.mxu0 %v4838_v23  ;;  %v5714_v23 = vld [vmem:[#allocation65_spill] sm:$0xff] }
 0x182   :  { %3463 = vmatpush3.xpose.msra.mxu0 %v4573_v61  ;;  %3502 = vmatpush3.xpose.msra.mxu1 %v4554_v48 }
 0x183   :  { %3464 = vmatprep.subr.mxu0 %v5698_v10  ;;  %3503 = vmatprep.subr.mxu1 %v5698_v10 }
 0x184   :  { %3494 = vmatprep.mubr.msk.f32.mxu0 %vm3985_vm0, %v5698_v10 }
 0x186   :  { %3465 = vmatpush3.xpose.msra.mxu0 %v4577_v11  ;;  %3504 = vmatpush3.xpose.msra.mxu1 %v4561_v1 }
 0x187   :  { %3466 = vmatprep.subr.mxu0 %v5698_v10  ;;  %3505 = vmatprep.subr.mxu1 %v5698_v10 }
 0x18a   :  { %3467 = vmatpush3.xpose.msra.mxu0 %v4582_v18  ;;  %3506 = vmatpush3.xpose.msra.mxu1 %v4613_v41 }
 0x18b   :  { %3468 = vmatprep.subr.mxu0 %v5698_v10  ;;  %3507 = vmatprep.subr.mxu1 %v5698_v10 }
 0x18e   :  { %3469 = vmatpush3.xpose.msra.mxu0 %v4599_v53  ;;  %3508 = vmatpush3.xpose.msra.mxu1 %v4629_v26 }
 0x18f   :  { %3470 = vmatprep.subr.mxu0 %v5698_v10  ;;  %3509 = vmatprep.subr.mxu1 %v5698_v10 }
 0x192   :  { %3471 = vmatpush3.xpose.msra.mxu0 %v4627_v37  ;;  %3510 = vmatpush3.xpose.msra.mxu1 %v4647_v21 }
 0x193   :  { %3472 = vmatprep.subr.mxu0 %v5698_v10  ;;  %3511 = vmatprep.subr.mxu1 %v5698_v10 }
 0x196   :  { %3473 = vmatpush3.xpose.msra.mxu0 %v4645_v22  ;;  %3512 = vmatpush3.xpose.msra.mxu1 %v4665_v49 }
 0x197   :  { %3474 = vmatprep.subr.mxu0 %v5698_v10  ;;  %3513 = vmatprep.subr.mxu1 %v5698_v10 }
 0x19a   :  { %3475 = vmatpush3.xpose.msra.mxu0 %v4663_v57  ;;  %3514 = vmatpush3.xpose.msra.mxu1 %v4683_v60 }
 0x19b   :  { %3476 = vmatprep.subr.mxu0 %v5698_v10  ;;  %3515 = vmatprep.subr.mxu1 %v5698_v10 }
 0x19e   :  { %3477 = vmatpush3.xpose.msra.mxu0 %v4681_v45  ;;  %3516 = vmatpush3.xpose.msra.mxu1 %v4697_v43 }
 0x19f   :  { %3478 = vmatprep.subr.mxu0 %v5698_v10  ;;  %3517 = vmatprep.subr.mxu1 %v5698_v10 }
 0x1a2   :  { %3479 = vmatpush3.xpose.msra.mxu0 %v4707_v32  ;;  %3518 = vmatpush3.xpose.msra.mxu1 %v4700_v33 }
 0x1a3   :  { %3480 = vmatprep.subr.mxu0 %v5698_v10  ;;  %3519 = vmatprep.subr.mxu1 %v5698_v10 }
 0x1a6   :  { %3481 = vmatpush3.xpose.msra.mxu0 %v4726_v19  ;;  %3520 = vmatpush3.xpose.msra.mxu1 %v4710_v34 }
 0x1a7   :  { %3482 = vmatprep.subr.mxu0 %v5698_v10  ;;  %3521 = vmatprep.subr.mxu1 %v5698_v10 }
 0x1aa   :  { %3483 = vmatpush3.xpose.msra.mxu0 %v4729_v16  ;;  %3522 = vmatpush3.xpose.msra.mxu1 %v4757_v54 }
 0x1ab   :  { %3484 = vmatprep.subr.mxu0 %v5698_v10  ;;  %3523 = vmatprep.subr.mxu1 %v5698_v10 }
 0x1ae   :  { %3485 = vmatpush3.xpose.msra.mxu0 %v4741_v24  ;;  %3524 = vmatpush3.xpose.msra.mxu1 %v4773_v13 }
 0x1af   :  { %3486 = vmatprep.subr.mxu0 %v5698_v10  ;;  %3525 = vmatprep.subr.mxu1 %v5698_v10 }
 0x1b2   :  { %3487 = vmatpush3.xpose.msra.mxu0 %v5699_v8  ;;  %3526 = vmatpush3.xpose.msra.mxu1 %v4791_v46 }
 0x1b3   :  { %3488 = vmatprep.subr.mxu0 %v5698_v10  ;;  %3527 = vmatprep.subr.mxu1 %v5698_v10 }
 0x1b6   :  { %3489 = vmatpush3.xpose.msra.mxu0 %v5700_v9  ;;  %3528 = vmatpush3.xpose.msra.mxu1 %v4809_v7 }
 0x1b7   :  { %3490 = vmatprep.subr.mxu0 %v5698_v10  ;;  %3567 = vmatprep.subr.mxu1 %v5698_v10 }
 0x1b9   :  { %3530 = vmatmul.mubr.f32.vlgmr.msra.gmra.mxu1 %v4835_v42 }
 0x1ba   :  { %3491 = vmatpush3.xpose.msra.mxu0 %v5701_v15  ;;  %3568 = vmatpush3.msra.mxu1 %v5702_v17  ;;  %v5718_v17 = vld [vmem:[#allocation71_spill] sm:$0xff] }
 0x1bb   :  { %3492 = vmatprep.subr.mxu0 %v5698_v10  ;;  %3569 = vmatprep.subr.mxu1 %v5698_v10 }
 0x1bc   :  { %3570 = vmatpush3.msra.mxu1 %v5703_v27  ;;  %3599 = vmatprep.mubr.msk.f32.mxu1 %vm3985_vm0, %v5698_v10  ;;  %v5719_v27 = vld [vmem:[#allocation18_spill] sm:$0xff] }
 0x1bd   :  { %3571 = vmatprep.subr.mxu1 %v5698_v10 }
 0x1be   :  { %3493 = vmatpush3.xpose.msra.mxu0 %v5704_v40  ;;  %3572 = vmatpush3.msra.mxu1 %v5705_v50  ;;  %v5720_v50 = vld [vmem:[#allocation74_spill] sm:$0xff]  ;;  %v5733_v40 = vld [vmem:[#allocation61_spill] sm:$0xff] }
 0x1bf   :  { %3573 = vmatprep.subr.mxu1 %v5698_v10  ;;  %3532 = vmatprep.subr.mxu0 %v5698_v10 }
 0x1c0   :  { %3574 = vmatpush3.msra.mxu1 %v5706_v30  ;;  %v5721_v30 = vld [vmem:[#allocation24_spill] sm:$0xff] }
 0x1c1   :  { %3495 = vmatmul.mubr.f32.vlgmr.msra.gmra.mxu0 %v4835_v42  ;;  %3575 = vmatprep.subr.mxu1 %v5698_v10  ;;  %v5712_v42 = vld [vmem:[#allocation60_spill] sm:$0xff] }
 0x1c2   :  { %3533 = vmatpush3.msra.mxu0 %v5707_v12  ;;  %3576 = vmatpush3.msra.mxu1 %v5708_v59  ;;  %v5722_v59 = vld [vmem:[#allocation76_spill] sm:$0xff] }
 0x1c3   :  { %3534 = vmatprep.subr.mxu0 %v5698_v10  ;;  %3577 = vmatprep.subr.mxu1 %v5698_v10 }
 0x1c4   :  { %3535 = vmatpush3.msra.mxu0 %v5709_v14  ;;  %3578 = vmatpush3.msra.mxu1 %v5710_v44  ;;  %v5723_v44 = vld [vmem:[#allocation28_spill] sm:$0xff] }
 0x1c5   :  { %3536 = vmatprep.subr.mxu0 %v5698_v10  ;;  %3579 = vmatprep.subr.mxu1 %v5698_v10 }
 0x1c6   :  { %3537 = vmatpush3.msra.mxu0 %v5711_v55  ;;  %3580 = vmatpush3.msra.mxu1 %v5712_v42  ;;  %v5724_v42 = vld [vmem:[#allocation78_spill] sm:$0xff] }
 0x1c7   :  { %3538 = vmatprep.subr.mxu0 %v5698_v10  ;;  %3581 = vmatprep.subr.mxu1 %v5698_v10 }
 0x1c8   :  { %3539 = vmatpush3.msra.mxu0 %v5713_v51  ;;  %3582 = vmatpush3.msra.mxu1 %v5714_v23  ;;  %v5725_v23 = vld [vmem:[#allocation37_spill] sm:$0xff] }
 0x1c9   :  { %3540 = vmatprep.subr.mxu0 %v5698_v10  ;;  %3583 = vmatprep.subr.mxu1 %v5698_v10 }
 0x1ca   :  { %3541 = vmatpush3.msra.mxu0 %v5715_v3  ;;  %3584 = vmatpush3.msra.mxu1 %v5716_v4  ;;  %v5726_v4 = vld [vmem:[#allocation79_spill] sm:$0xff] }
 0x1cb   :  { %3542 = vmatprep.subr.mxu0 %v5698_v10  ;;  %3585 = vmatprep.subr.mxu1 %v5698_v10 }
 0x1cc   :  { %3543 = vmatpush3.msra.mxu0 %v5717_v2  ;;  %3586 = vmatpush3.msra.mxu1 %v5718_v17  ;;  %v5727_v17 = vld [vmem:[#allocation42_spill] sm:$0xff] }
 0x1cd   :  { %3544 = vmatprep.subr.mxu0 %v5698_v10  ;;  %3587 = vmatprep.subr.mxu1 %v5698_v10 }
 0x1ce   :  { %3545 = vmatpush3.msra.mxu0 %v5719_v27  ;;  %3588 = vmatpush3.msra.mxu1 %v5720_v50  ;;  %v5728_v50 = vld [vmem:[#allocation80_spill] sm:$0xff] }
 0x1cf   :  { %3546 = vmatprep.subr.mxu0 %v5698_v10  ;;  %3589 = vmatprep.subr.mxu1 %v5698_v10 }
 0x1d0   :  { %3547 = vmatpush3.msra.mxu0 %v5721_v30  ;;  %3590 = vmatpush3.msra.mxu1 %v5722_v59  ;;  %v5729_v59 = vld [vmem:[#allocation46_spill] sm:$0xff] }
 0x1d1   :  { %3548 = vmatprep.subr.mxu0 %v5698_v10  ;;  %3591 = vmatprep.subr.mxu1 %v5698_v10 }
 0x1d2   :  { %3549 = vmatpush3.msra.mxu0 %v5723_v44  ;;  %3592 = vmatpush3.msra.mxu1 %v5724_v42  ;;  %v5730_v42 = vld [vmem:[#allocation81_spill] sm:$0xff] }
 0x1d3   :  { %3550 = vmatprep.subr.mxu0 %v5698_v10  ;;  %3593 = vmatprep.subr.mxu1 %v5698_v10 }
 0x1d4   :  { %3551 = vmatpush3.msra.mxu0 %v5725_v23  ;;  %3594 = vmatpush3.msra.mxu1 %v5726_v4  ;;  %v5731_v4 = vld [vmem:[#allocation52_spill] sm:$0xff] }
 0x1d5   :  { %3552 = vmatprep.subr.mxu0 %v5698_v10  ;;  %3595 = vmatprep.subr.mxu1 %v5698_v10 }
 0x1d6   :  { %3553 = vmatpush3.msra.mxu0 %v5727_v17  ;;  %3596 = vmatpush3.msra.mxu1 %v5728_v50  ;;  %v5732_v50 = vld [vmem:[#allocation56_spill] sm:$0xff] }
 0x1d7   :  { %3554 = vmatprep.subr.mxu0 %v5698_v10  ;;  %3597 = vmatprep.subr.mxu1 %v5698_v10 }
 0x1d8   :  { %3555 = vmatpush3.msra.mxu0 %v5729_v59  ;;  %3598 = vmatpush3.msra.mxu1 %v5730_v42  ;;  %v5734_v42 = vld [vmem:[#allocation64_spill] sm:$0xff] }
 0x1d9   :  { %3556 = vmatprep.subr.mxu0 %v5698_v10  ;;  %3637 = vmatprep.subr.mxu1 %v5698_v10 }
 0x1da   :  { %3557 = vmatpush3.msra.mxu0 %v5731_v4  ;;  %3564 = vmatprep.mubr.msk.f32.mxu0 %vm3985_vm0, %v5698_v10 }
 0x1db   :  { %3558 = vmatprep.subr.mxu0 %v5698_v10 }
 0x1dc   :  { %3559 = vmatpush3.msra.mxu0 %v5732_v50 }
 0x1dd   :  { %3560 = vmatprep.subr.mxu0 %v5698_v10 }
 0x1de   :  { %3561 = vmatpush3.msra.mxu0 %v5733_v40 }
 0x1df   :  { %3562 = vmatprep.subr.mxu0 %v5698_v10 }
 0x1e0   :  { %3563 = vmatpush3.msra.mxu0 %v5734_v42 }
 0x1e1   :  { %3602 = vmatprep.subr.mxu0 %v5698_v10 }
 0x1f9   :  { %v967_v15 = vpop.f32.mrf.mxu1 }
 0x1fb   :  { %v3391_v9 = vpop.f32.mrf.mxu1 }
 0x201   :  { %v816_v8 = vpop.f32.mrf.mxu0 }
 0x202   :  { %v968_v24 = vadd.f32 %v967_v15, %v816_v8  ;;  %v5744_v8 = vld [vmem:[#allocation48_spill] sm:$0xff]  ;;  %v5745_v15 = vld [vmem:[#allocation53_spill] sm:$0xff] }
 0x203   :  { %v3356_v16 = vpop.f32.mrf.mxu0 }
 0x239   :  { %v1160_v19 = vpop.f32.mrf.mxu1 }
 0x23b   :  { %v3461_v32 = vpop.f32.mrf.mxu1 }
 0x241   :  { %v1071_v45 = vpop.f32.mrf.mxu0 }
 0x242   :  { %v1072_v57 = vadd.f32 %v1071_v45, %v968_v24  ;;  %v5739_v45 = vld [vmem:[#allocation25_spill] sm:$0xff] }
 0x243   :  { %v3426_v22 = vpop.f32.mrf.mxu0 }
 0x244   :  { %v1161_v37 = vadd.f32 %v1160_v19, %v1072_v57  ;;  %v5737_v57 = vld [vmem:[#allocation20_spill] sm:$0xff] }
 0x279   :  { %v1366_v53 = vpop.f32.mrf.mxu1 }
 0x27b   :  { %v3531_v18 = vpop.f32.mrf.mxu1 }
 0x281   :  { %v1279_v11 = vpop.f32.mrf.mxu0 }
 0x282   :  { %v1280_v61 = vadd.f32 %v1279_v11, %v1161_v37  ;;  %v5741_v11 = vld [vmem:[#allocation32_spill] sm:$0xff] }
 0x283   :  { %v3496_v52 = vpop.f32.mrf.mxu0  ;;  %v5742_v37 = vld [vmem:[#allocation40_spill] sm:$0xff] }
 0x284   :  { %v1367_v31 = vadd.f32 %v1366_v53, %v1280_v61  ;;  %v5735_v52 = vld [vmem:[#allocation15_spill] sm:$0xff]  ;;  %v5736_v53 = vld [vmem:[#allocation17_spill] sm:$0xff]  ;;  %v5740_v61 = vld [vmem:[#allocation30_spill] sm:$0xff] }
 0x286   :  { %v5057_v9 = vsub.f32 %v3961_v47, %v1367_v31  ;;  %v5738_v31 = vld [vmem:[#allocation21_spill] sm:$0xff]  ;;  %v5743_v47 = vld [vmem:[#allocation43_spill] sm:$0xff] }
 0x288   :  { %v1371_v16 = vmul.f32 %v5057_v9, %v5057_v9 }
 0x28a   :  { %v5061_v32 = vand.u32 4294901760, %v1371_v16 }
 0x28c   :  { %3600 = vmatmul.mubr.f32.vlgmr.msra.gmra.mxu1 %v5061_v32  ;;  %v5065_v19 = vsub.f32 %v1371_v16, %v5061_v32  ;;  %v5746_v16 = vld [vmem:[#allocation59_spill] sm:$0xff] }
 0x28d   :  { %3638 = vmatpush3.msra.mxu1 %v5707_v12  ;;  %3669 = vmatprep.mubr.msk.f32.mxu1 %vm3985_vm0, %v5698_v10 }
 0x28e   :  { %3639 = vmatprep.subr.mxu1 %v5698_v10  ;;  %v1455_v18 = vand.u32 4294901760, %v5065_v19 }
 0x28f   :  { %3640 = vmatpush3.msra.mxu1 %v5709_v14 }
 0x290   :  { %3641 = vmatprep.subr.mxu1 %v5698_v10  ;;  %v1456_v22 = vsub.f32 %v5065_v19, %v1455_v18 }
 0x291   :  { %3642 = vmatpush3.msra.mxu1 %v5711_v55 }
 0x292   :  { %3643 = vmatprep.subr.mxu1 %v5698_v10  ;;  %v1457_v24 = vand.u32 4294901760, %v1456_v22  ;;  %v5747_v22 = vld [vmem:[#allocation63_spill] sm:$0xff] }
 0x293   :  { %3644 = vmatpush3.msra.mxu1 %v5713_v51 }
 0x294   :  { %3645 = vmatprep.subr.mxu1 %v5698_v10  ;;  %3565 = vmatmul.mubr.f32.vlgmr.msra.gmra.mxu0 %v1457_v24  ;;  %v5748_v24 = vld [vmem:[#allocation67_spill] sm:$0xff] }
 0x295   :  { %3603 = vmatpush3.msra.mxu0 %v5735_v52  ;;  %3646 = vmatpush3.msra.mxu1 %v5715_v3  ;;  %v5749_v52 = vld [vmem:[#allocation70_spill] sm:$0xff] }
 0x296   :  { %3604 = vmatprep.subr.mxu0 %v5698_v10  ;;  %3647 = vmatprep.subr.mxu1 %v5698_v10 }
 0x297   :  { %3605 = vmatpush3.msra.mxu0 %v5736_v53  ;;  %3648 = vmatpush3.msra.mxu1 %v5717_v2  ;;  %v5768_v53 = vld [vmem:[#allocation85_spill] sm:$0xff] }
 0x298   :  { %3606 = vmatprep.subr.mxu0 %v5698_v10  ;;  %3649 = vmatprep.subr.mxu1 %v5698_v10 }
 0x299   :  { %3607 = vmatpush3.msra.mxu0 %v5737_v57  ;;  %3650 = vmatpush3.msra.mxu1 %v5719_v27  ;;  %v5769_v57 = vld [vmem:[#allocation87_spill] sm:$0xff] }
 0x29a   :  { %3608 = vmatprep.subr.mxu0 %v5698_v10  ;;  %3651 = vmatprep.subr.mxu1 %v5698_v10 }
 0x29b   :  { %3609 = vmatpush3.msra.mxu0 %v5738_v31  ;;  %3652 = vmatpush3.msra.mxu1 %v5721_v30  ;;  %v5771_v31 = vld [vmem:[#allocation13_spill] sm:$0xff] }
 0x29c   :  { %3610 = vmatprep.subr.mxu0 %v5698_v10  ;;  %3653 = vmatprep.subr.mxu1 %v5698_v10 }
 0x29d   :  { %3611 = vmatpush3.msra.mxu0 %v5739_v45  ;;  %3654 = vmatpush3.msra.mxu1 %v5723_v44  ;;  %v5772_v45 = vld [vmem:[#allocation14_spill] sm:$0xff] }
 0x29e   :  { %3612 = vmatprep.subr.mxu0 %v5698_v10  ;;  %3655 = vmatprep.subr.mxu1 %v5698_v10 }
 0x29f   :  { %3613 = vmatpush3.msra.mxu0 %v5740_v61  ;;  %3656 = vmatpush3.msra.mxu1 %v5725_v23  ;;  %v5773_v61 = vld [vmem:[#allocation19_spill] sm:$0xff] }
 0x2a0   :  { %3614 = vmatprep.subr.mxu0 %v5698_v10  ;;  %3657 = vmatprep.subr.mxu1 %v5698_v10 }
 0x2a1   :  { %3615 = vmatpush3.msra.mxu0 %v5741_v11  ;;  %3658 = vmatpush3.msra.mxu1 %v5727_v17  ;;  %v5774_v11 = vld [vmem:[#allocation29_spill] sm:$0xff] }
 0x2a2   :  { %3616 = vmatprep.subr.mxu0 %v5698_v10  ;;  %3659 = vmatprep.subr.mxu1 %v5698_v10 }
 0x2a3   :  { %3617 = vmatpush3.msra.mxu0 %v5742_v37  ;;  %3660 = vmatpush3.msra.mxu1 %v5729_v59  ;;  %v5775_v37 = vld [vmem:[#allocation92_spill] sm:$0xff] }
 0x2a4   :  { %3618 = vmatprep.subr.mxu0 %v5698_v10  ;;  %3661 = vmatprep.subr.mxu1 %v5698_v10 }
 0x2a5   :  { %3619 = vmatpush3.msra.mxu0 %v5743_v47  ;;  %3662 = vmatpush3.msra.mxu1 %v5731_v4  ;;  %v5776_v47 = vld [vmem:[#allocation94_spill] sm:$0xff] }
 0x2a6   :  { %3620 = vmatprep.subr.mxu0 %v5698_v10  ;;  %3663 = vmatprep.subr.mxu1 %v5698_v10 }
 0x2a7   :  { %3621 = vmatpush3.msra.mxu0 %v5744_v8  ;;  %3664 = vmatpush3.msra.mxu1 %v5732_v50  ;;  %v5777_v8 = vld [vmem:[#allocation95_spill] sm:$0xff] }
 0x2a8   :  { %3622 = vmatprep.subr.mxu0 %v5698_v10  ;;  %3665 = vmatprep.subr.mxu1 %v5698_v10 }
 0x2a9   :  { %3623 = vmatpush3.msra.mxu0 %v5745_v15  ;;  %3666 = vmatpush3.msra.mxu1 %v5733_v40  ;;  %v5778_v15 = vld [vmem:[#allocation44_spill] sm:$0xff] }
 0x2aa   :  { %3624 = vmatprep.subr.mxu0 %v5698_v10  ;;  %3667 = vmatprep.subr.mxu1 %v5698_v10 }
 0x2ab   :  { %3625 = vmatpush3.msra.mxu0 %v5746_v16  ;;  %3668 = vmatpush3.msra.mxu1 %v5734_v42  ;;  %v5779_v16 = vld [vmem:[#allocation55_spill] sm:$0xff] }
 0x2ac   :  { %3626 = vmatprep.subr.mxu0 %v5698_v10  ;;  %3670 = vmatmul.mubr.f32.vlgmr.msra.gmra.mxu1 %v1455_v18  ;;  %v5767_v18 = vld [vmem:[#allocation77_spill] sm:$0xff] }
 0x2ad   :  { %3707 = vmatprep.subr.mxu1 %v5698_v10  ;;  %3627 = vmatpush3.msra.mxu0 %v5747_v22  ;;  %v5780_v22 = vld [vmem:[#allocation58_spill] sm:$0xff] }
 0x2ae   :  { %3708 = vmatpush3.msra.mxu1 %v5707_v12  ;;  %3628 = vmatprep.subr.mxu0 %v5698_v10  ;;  %v5750_v12 = vld [vmem:[#allocation73_spill] sm:$0xff] }
 0x2af   :  { %3709 = vmatprep.subr.mxu1 %v5698_v10  ;;  %3629 = vmatpush3.msra.mxu0 %v5748_v24  ;;  %v5781_v24 = vld [vmem:[#allocation101_spill] sm:$0xff] }
 0x2b0   :  { %3710 = vmatpush3.msra.mxu1 %v5709_v14  ;;  %3630 = vmatprep.subr.mxu0 %v5698_v10  ;;  %v5751_v14 = vld [vmem:[#allocation22_spill] sm:$0xff] }
 0x2b1   :  { %3711 = vmatprep.subr.mxu1 %v5698_v10  ;;  %3631 = vmatpush3.msra.mxu0 %v5749_v52  ;;  %v5782_v52 = vld [vmem:[#allocation103_spill] sm:$0xff] }
 0x2b2   :  { %3712 = vmatpush3.msra.mxu1 %v5711_v55  ;;  %3632 = vmatprep.subr.mxu0 %v5698_v10  ;;  %v5752_v55 = vld [vmem:[#allocation23_spill] sm:$0xff] }
 0x2b3   :  { %3713 = vmatprep.subr.mxu1 %v5698_v10  ;;  %3633 = vmatpush3.msra.mxu0 %v5750_v12 }
 0x2b4   :  { %3634 = vmatprep.mubr.msk.f32.mxu0 %vm3985_vm0, %v5698_v10  ;;  %3714 = vmatpush3.msra.mxu1 %v5713_v51  ;;  %v5753_v51 = vld [vmem:[#allocation26_spill] sm:$0xff] }
 0x2b5   :  { %3635 = vmatmul.mubr.f32.vlgmr.msra.gmra.mxu0 %v5065_v19  ;;  %3672 = vmatprep.subr.mxu0 %v5698_v10  ;;  %v5765_v19 = vld [vmem:[#allocation84_spill] sm:$0xff] }
 0x2b6   :  { %3715 = vmatprep.subr.mxu1 %v5698_v10  ;;  %3673 = vmatpush3.msra.mxu0 %v5751_v14 }
 0x2b7   :  { %3716 = vmatpush3.msra.mxu1 %v5715_v3  ;;  %3674 = vmatprep.subr.mxu0 %v5698_v10  ;;  %v5754_v3 = vld [vmem:[#allocation27_spill] sm:$0xff] }
 0x2b8   :  { %3717 = vmatprep.subr.mxu1 %v5698_v10  ;;  %3675 = vmatpush3.msra.mxu0 %v5752_v55 }
 0x2b9   :  { %3718 = vmatpush3.msra.mxu1 %v5717_v2  ;;  %3676 = vmatprep.subr.mxu0 %v5698_v10  ;;  %v5755_v2 = vld [vmem:[#allocation31_spill] sm:$0xff] }
 0x2ba   :  { %3719 = vmatprep.subr.mxu1 %v5698_v10  ;;  %3677 = vmatpush3.msra.mxu0 %v5753_v51 }
 0x2bb   :  { %3720 = vmatpush3.msra.mxu1 %v5719_v27  ;;  %3678 = vmatprep.subr.mxu0 %v5698_v10  ;;  %v5756_v27 = vld [vmem:[#allocation33_spill] sm:$0xff] }
 0x2bc   :  { %3721 = vmatprep.subr.mxu1 %v5698_v10  ;;  %3679 = vmatpush3.msra.mxu0 %v5754_v3 }
 0x2bd   :  { %3722 = vmatpush3.msra.mxu1 %v5721_v30  ;;  %3680 = vmatprep.subr.mxu0 %v5698_v10  ;;  %v5757_v30 = vld [vmem:[#allocation38_spill] sm:$0xff] }
 0x2be   :  { %3723 = vmatprep.subr.mxu1 %v5698_v10  ;;  %3681 = vmatpush3.msra.mxu0 %v5755_v2 }
 0x2bf   :  { %3724 = vmatpush3.msra.mxu1 %v5723_v44  ;;  %3682 = vmatprep.subr.mxu0 %v5698_v10  ;;  %v5758_v44 = vld [vmem:[#allocation47_spill] sm:$0xff] }
 0x2c0   :  { %3725 = vmatprep.subr.mxu1 %v5698_v10  ;;  %3683 = vmatpush3.msra.mxu0 %v5756_v27 }
 0x2c1   :  { %3726 = vmatpush3.msra.mxu1 %v5725_v23  ;;  %3684 = vmatprep.subr.mxu0 %v5698_v10  ;;  %v5759_v23 = vld [vmem:[#allocation49_spill] sm:$0xff] }
 0x2c2   :  { %3727 = vmatprep.subr.mxu1 %v5698_v10  ;;  %3685 = vmatpush3.msra.mxu0 %v5757_v30 }
 0x2c3   :  { %3728 = vmatpush3.msra.mxu1 %v5727_v17  ;;  %3686 = vmatprep.subr.mxu0 %v5698_v10  ;;  %v5760_v17 = vld [vmem:[#allocation57_spill] sm:$0xff] }
 0x2c4   :  { %3729 = vmatprep.subr.mxu1 %v5698_v10  ;;  %3687 = vmatpush3.msra.mxu0 %v5758_v44 }
 0x2c5   :  { %3730 = vmatpush3.msra.mxu1 %v5729_v59  ;;  %3688 = vmatprep.subr.mxu0 %v5698_v10  ;;  %v5761_v59 = vld [vmem:[#allocation62_spill] sm:$0xff] }
 0x2c6   :  { %3731 = vmatprep.subr.mxu1 %v5698_v10  ;;  %3689 = vmatpush3.msra.mxu0 %v5759_v23 }
 0x2c7   :  { %3732 = vmatpush3.msra.mxu1 %v5731_v4  ;;  %3690 = vmatprep.subr.mxu0 %v5698_v10  ;;  %v5762_v4 = vld [vmem:[#allocation66_spill] sm:$0xff] }
 0x2c8   :  { %3733 = vmatprep.subr.mxu1 %v5698_v10  ;;  %3691 = vmatpush3.msra.mxu0 %v5760_v17 }
 0x2c9   :  { %3734 = vmatpush3.msra.mxu1 %v5732_v50  ;;  %3692 = vmatprep.subr.mxu0 %v5698_v10  ;;  %v5763_v50 = vld [vmem:[#allocation69_spill] sm:$0xff] }
 0x2ca   :  { %3735 = vmatprep.subr.mxu1 %v5698_v10  ;;  %3693 = vmatpush3.msra.mxu0 %v5761_v59 }
 0x2cb   :  { %3736 = vmatpush3.msra.mxu1 %v5733_v40  ;;  %3694 = vmatprep.subr.mxu0 %v5698_v10  ;;  %v5764_v40 = vld [vmem:[#allocation72_spill] sm:$0xff] }
 0x2cc   :  { %3737 = vmatprep.subr.mxu1 %v5698_v10  ;;  %3695 = vmatpush3.msra.mxu0 %v5762_v4 }
 0x2cd   :  { %3738 = vmatpush3.msra.mxu1 %v5734_v42  ;;  %3739 = vmatprep.mubr.msk.f32.mxu1 %vm3985_vm0, %v5698_v10  ;;  %v5766_v42 = vld [vmem:[#allocation75_spill] sm:$0xff] }
 0x2ce   :  { %3696 = vmatprep.subr.mxu0 %v5698_v10  ;;  %3740 = vmatmul.mubr.f32.vlgmr.msra.gmra.mxu1 %v5061_v32 }
 0x2cf   :  { %3697 = vmatpush3.msra.mxu0 %v5763_v50  ;;  %3704 = vmatprep.mubr.msk.f32.mxu0 %vm3985_vm0, %v5698_v10 }
 0x2d0   :  { %3698 = vmatprep.subr.mxu0 %v5698_v10  ;;  %3777 = vmatprep.subr.mxu1 %v5698_v10 }
 0x2d1   :  { %3699 = vmatpush3.msra.mxu0 %v5764_v40  ;;  %3778 = vmatpush3.xpose.msra.mxu1 %v5765_v19 }
 0x2d2   :  { %3700 = vmatprep.subr.mxu0 %v5698_v10  ;;  %3779 = vmatprep.subr.mxu1 %v5698_v10 }
 0x2d3   :  { %3701 = vmatpush3.msra.mxu0 %v5766_v42  ;;  %3809 = vmatprep.mubr.msk.f32.mxu1 %vm3985_vm0, %v5698_v10 }
 0x2d4   :  { %3702 = vmatprep.subr.mxu0 %v5698_v10 }
 0x2d5   :  { %3703 = vmatpush3.msra.mxu0 %v5767_v18  ;;  %3780 = vmatpush3.xpose.msra.mxu1 %v5768_v53 }
 0x2d6   :  { %3705 = vmatmul.mubr.f32.vlgmr.msra.gmra.mxu0 %v5061_v32  ;;  %3742 = vmatprep.subr.mxu0 %v5698_v10  ;;  %v5770_v32 = vld [vmem:[#allocation8_spill] sm:$0xff] }
 0x2d7   :  { %3781 = vmatprep.subr.mxu1 %v5698_v10  ;;  %3743 = vmatpush3.xpose.msra.mxu0 %v4543_v28 }
 0x2d8   :  { %3744 = vmatprep.subr.mxu0 %v5698_v10  ;;  %3774 = vmatprep.mubr.msk.f32.mxu0 %vm3985_vm0, %v5698_v10 }
 0x2d9   :  { %3782 = vmatpush3.xpose.msra.mxu1 %v5769_v57 }
 0x2da   :  { %3783 = vmatprep.subr.mxu1 %v5698_v10 }
 0x2db   :  { %3745 = vmatpush3.xpose.msra.mxu0 %v4552_v39 }
 0x2dc   :  { %3746 = vmatprep.subr.mxu0 %v5698_v10 }
 0x2dd   :  { %3784 = vmatpush3.xpose.msra.mxu1 %v5770_v32 }
 0x2de   :  { %3785 = vmatprep.subr.mxu1 %v5698_v10 }
 0x2df   :  { %3747 = vmatpush3.xpose.msra.mxu0 %v4554_v48 }
 0x2e0   :  { %3748 = vmatprep.subr.mxu0 %v5698_v10 }
 0x2e1   :  { %3786 = vmatpush3.xpose.msra.mxu1 %v5771_v31 }
 0x2e2   :  { %3787 = vmatprep.subr.mxu1 %v5698_v10 }
 0x2e3   :  { %3749 = vmatpush3.xpose.msra.mxu0 %v4561_v1 }
 0x2e4   :  { %3750 = vmatprep.subr.mxu0 %v5698_v10 }
 0x2e5   :  { %3788 = vmatpush3.xpose.msra.mxu1 %v5772_v45 }
 0x2e6   :  { %3789 = vmatprep.subr.mxu1 %v5698_v10 }
 0x2e7   :  { %3751 = vmatpush3.xpose.msra.mxu0 %v4613_v41 }
 0x2e8   :  { %3752 = vmatprep.subr.mxu0 %v5698_v10 }
 0x2e9   :  { %3790 = vmatpush3.xpose.msra.mxu1 %v5773_v61 }
 0x2ea   :  { %3791 = vmatprep.subr.mxu1 %v5698_v10 }
 0x2eb   :  { %3753 = vmatpush3.xpose.msra.mxu0 %v4629_v26 }
 0x2ec   :  { %3754 = vmatprep.subr.mxu0 %v5698_v10 }
 0x2ed   :  { %3792 = vmatpush3.xpose.msra.mxu1 %v5774_v11 }
 0x2ee   :  { %3793 = vmatprep.subr.mxu1 %v5698_v10 }
 0x2ef   :  { %3755 = vmatpush3.xpose.msra.mxu0 %v4647_v21 }
 0x2f0   :  { %3756 = vmatprep.subr.mxu0 %v5698_v10 }
 0x2f1   :  { %3794 = vmatpush3.xpose.msra.mxu1 %v5775_v37 }
 0x2f2   :  { %3795 = vmatprep.subr.mxu1 %v5698_v10 }
 0x2f3   :  { %3757 = vmatpush3.xpose.msra.mxu0 %v4665_v49 }
 0x2f4   :  { %3758 = vmatprep.subr.mxu0 %v5698_v10 }
 0x2f5   :  { %3796 = vmatpush3.xpose.msra.mxu1 %v5776_v47 }
 0x2f6   :  { %3797 = vmatprep.subr.mxu1 %v5698_v10 }
 0x2f7   :  { %3759 = vmatpush3.xpose.msra.mxu0 %v4683_v60 }
 0x2f8   :  { %3760 = vmatprep.subr.mxu0 %v5698_v10 }
 0x2f9   :  { %3798 = vmatpush3.xpose.msra.mxu1 %v5777_v8 }
 0x2fa   :  { %3799 = vmatprep.subr.mxu1 %v5698_v10 }
 0x2fb   :  { %3761 = vmatpush3.xpose.msra.mxu0 %v4697_v43 }
 0x2fc   :  { %3762 = vmatprep.subr.mxu0 %v5698_v10 }
 0x2fd   :  { %3800 = vmatpush3.xpose.msra.mxu1 %v5778_v15 }
 0x2fe   :  { %3801 = vmatprep.subr.mxu1 %v5698_v10 }
 0x2ff   :  { %3763 = vmatpush3.xpose.msra.mxu0 %v4700_v33 }
 0x300   :  { %3764 = vmatprep.subr.mxu0 %v5698_v10 }
 0x301   :  { %3802 = vmatpush3.xpose.msra.mxu1 %v5779_v16 }
 0x302   :  { %3803 = vmatprep.subr.mxu1 %v5698_v10 }
 0x303   :  { %3765 = vmatpush3.xpose.msra.mxu0 %v4710_v34 }
 0x304   :  { %3766 = vmatprep.subr.mxu0 %v5698_v10 }
 0x305   :  { %3804 = vmatpush3.xpose.msra.mxu1 %v5780_v22 }
 0x306   :  { %3805 = vmatprep.subr.mxu1 %v5698_v10 }
 0x307   :  { %3767 = vmatpush3.xpose.msra.mxu0 %v4757_v54 }
 0x308   :  { %3768 = vmatprep.subr.mxu0 %v5698_v10 }
 0x309   :  { %3806 = vmatpush3.xpose.msra.mxu1 %v5781_v24 }
 0x30a   :  { %3807 = vmatprep.subr.mxu1 %v5698_v10 }
 0x30b   :  { %3769 = vmatpush3.xpose.msra.mxu0 %v4773_v13 }
 0x30c   :  { %3770 = vmatprep.subr.mxu0 %v5698_v10 }
 0x30d   :  { %3808 = vmatpush3.xpose.msra.mxu1 %v5782_v52 }
 0x30e   :  { %3847 = vmatprep.subr.mxu1 %v5698_v10 }
 0x30f   :  { %3771 = vmatpush3.xpose.msra.mxu0 %v4791_v46 }
 0x310   :  { %3772 = vmatprep.subr.mxu0 %v5698_v10 }
 0x313   :  { %3773 = vmatpush3.xpose.msra.mxu0 %v4809_v7 }
 0x314   :  { %3812 = vmatprep.subr.mxu0 %v5698_v10 }
 0x34c   :  { %v1610_v12 = vpop.f32.mrf.mxu1 }
 0x34e   :  { %v3601_v14 = vpop.f32.mrf.mxu1 }
 0x354   :  { %v1459_v55 = vpop.f32.mrf.mxu0 }
 0x355   :  { %v1611_v23 = vadd.f32 %v1610_v12, %v1459_v55 }
 0x356   :  { %v3566_v51 = vpop.f32.mrf.mxu0 }
 0x36c   :  { %v1803_v3 = vpop.f32.mrf.mxu1 }
 0x36e   :  { %v3671_v2 = vpop.f32.mrf.mxu1 }
 0x375   :  { %v1714_v27 = vpop.f32.mrf.mxu0 }
 0x376   :  { %v1715_v59 = vadd.f32 %v1714_v27, %v1611_v23  ;;  %v2703_v27 = vld [vmem:[%s5434_s2] ss:$0 sm:$0xff] }
 0x377   :  { %v3636_v30 = vpop.f32.mrf.mxu0 }
 0x378   :  { %v1804_v4 = vadd.f32 %v1803_v3, %v1715_v59  ;;  %v2702_v3 = vld [vmem:[%s5433_s1] ss:$0 sm:$0xff] }
 0x38e   :  { %v2009_v44 = vpop.f32.mrf.mxu1 }
 0x390   :  { %v3741_v17 = vpop.f32.mrf.mxu1 }
 0x396   :  { %v1922_v50 = vpop.f32.mrf.mxu0 }
 0x397   :  { %v1923_v40 = vadd.f32 %v1922_v50, %v1804_v4 }
 0x398   :  { %v3706_v19 = vpop.f32.mrf.mxu0 }
 0x399   :  { %v2010_v42 = vadd.f32 %v2009_v44, %v1923_v40 }
 0x39b   :  { %v2013_v18 = vmul.f32 0.032258064, %v2010_v42 }
 0x39d   :  { %3957 = vrsqrt.f32 %v2013_v18  ;;  %vm2016_vm2 = vcmp.eq.f32.partialorder %v2013_v18, inf  ;;  %v2019_v32 = vand.u32 2147483648, %v2013_v18  ;;  %vm2018_vm3 = vcmp.eq.f32.partialorder %v2013_v18, 0.0 }
 0x3aa   :  { %v3958_v53 = vpop.eup %3957 }
 0x3ab   :  { %v2015_v57 = vmul.f32 %v3958_v53, %v2013_v18 }
 0x3ad   :  { %v2017_v31 = vsel %vm2016_vm2, %v2013_v18, %v2015_v57 }
 0x3ae   :  { %v2020_v45 = vsel %vm2018_vm3, %v2019_v32, %v2017_v31 }
 0x3af   :  { %v2021_v61 = vadd.f32 1e-06, %v2020_v45 }
 0x3b1   :  { %3959 = vrcp.f32 %v2021_v61 }
 0x3be   :  { %v3960_v11 = vpop.eup %3959 }
 0x3bf   :  { %v2025_v37 = vsel %vm677_vm1, %v3960_v11, 0 }
 0x3c0   :  { %v5277_v47 = vand.u32 4294901760, %v2025_v37 }
 0x3c2   :  { %v5280_v8 = vsub.f32 %v2025_v37, %v5277_v47  ;;  %3810 = vmatmul.mubr.f32.vlgmr.msra.gmra.mxu1 %v5277_v47 }
 0x3c3   :  { %3848 = vmatpush3.xpose.msra.mxu1 %v4543_v28  ;;  %3879 = vmatprep.mubr.msk.f32.mxu1 %vm3985_vm0, %v5698_v10 }
 0x3c4   :  { %3849 = vmatprep.subr.mxu1 %v5698_v10  ;;  %v2110_v15 = vand.u32 4294901760, %v5280_v8 }
 0x3c6   :  { %v2111_v16 = vsub.f32 %v5280_v8, %v2110_v15 }
 0x3c7   :  { %3850 = vmatpush3.xpose.msra.mxu1 %v4552_v39 }
 0x3c8   :  { %3851 = vmatprep.subr.mxu1 %v5698_v10  ;;  %v2112_v22 = vand.u32 4294901760, %v2111_v16 }
 0x3ca   :  { %3775 = vmatmul.mubr.f32.vlgmr.msra.gmra.mxu0 %v2112_v22 }
 0x3cb   :  { %3813 = vmatpush3.xpose.msra.mxu0 %v4559_v0  ;;  %3852 = vmatpush3.xpose.msra.mxu1 %v4554_v48  ;;  %v5790_v0 = vld [vmem:[#allocation12_spill] sm:$0xff] }
 0x3cc   :  { %3814 = vmatprep.subr.mxu0 %v5698_v10  ;;  %3853 = vmatprep.subr.mxu1 %v5698_v10 }
 0x3cd   :  { %3844 = vmatprep.mubr.msk.f32.mxu0 %vm3985_vm0, %v5698_v10 }
 0x3cf   :  { %3815 = vmatpush3.xpose.msra.mxu0 %v4564_v5  ;;  %3854 = vmatpush3.xpose.msra.mxu1 %v4561_v1  ;;  %v5799_v5 = vld [vmem:[#allocation97_spill] sm:$0xff] }
 0x3d0   :  { %3816 = vmatprep.subr.mxu0 %v5698_v10  ;;  %3855 = vmatprep.subr.mxu1 %v5698_v10 }
 0x3d3   :  { %3817 = vmatpush3.xpose.msra.mxu0 %v4568_v6  ;;  %3856 = vmatpush3.xpose.msra.mxu1 %v4613_v41  ;;  %v5801_v6 = vld [vmem:[#allocation102_spill] sm:$0xff] }
 0x3d4   :  { %3818 = vmatprep.subr.mxu0 %v5698_v10  ;;  %3857 = vmatprep.subr.mxu1 %v5698_v10 }
 0x3d7   :  { %3819 = vmatpush3.xpose.msra.mxu0 %v4585_v62  ;;  %3858 = vmatpush3.xpose.msra.mxu1 %v4629_v26 }
 0x3d8   :  { %3820 = vmatprep.subr.mxu0 %v5698_v10  ;;  %3859 = vmatprep.subr.mxu1 %v5698_v10 }
 0x3db   :  { %3821 = vmatpush3.xpose.msra.mxu0 %v4620_v56  ;;  %3860 = vmatpush3.xpose.msra.mxu1 %v4647_v21 }
 0x3dc   :  { %3822 = vmatprep.subr.mxu0 %v5698_v10  ;;  %3861 = vmatprep.subr.mxu1 %v5698_v10 }
 0x3df   :  { %3823 = vmatpush3.xpose.msra.mxu0 %v4636_v36  ;;  %3862 = vmatpush3.xpose.msra.mxu1 %v4665_v49 }
 0x3e0   :  { %3824 = vmatprep.subr.mxu0 %v5698_v10  ;;  %3863 = vmatprep.subr.mxu1 %v5698_v10 }
 0x3e3   :  { %3825 = vmatpush3.xpose.msra.mxu0 %v4654_v35  ;;  %3864 = vmatpush3.xpose.msra.mxu1 %v4683_v60  ;;  %v5785_v35 = vld [vmem:[#allocation100_spill] sm:$0xff] }
 0x3e4   :  { %3826 = vmatprep.subr.mxu0 %v5698_v10  ;;  %3865 = vmatprep.subr.mxu1 %v5698_v10 }
 0x3e7   :  { %3827 = vmatpush3.xpose.msra.mxu0 %v4672_v25  ;;  %3866 = vmatpush3.xpose.msra.mxu1 %v4697_v43  ;;  %v5784_v25 = vld [vmem:[#allocation98_spill] sm:$0xff] }
 0x3e8   :  { %3828 = vmatprep.subr.mxu0 %v5698_v10  ;;  %3867 = vmatprep.subr.mxu1 %v5698_v10 }
 0x3eb   :  { %3829 = vmatpush3.xpose.msra.mxu0 %v4690_v63  ;;  %3868 = vmatpush3.xpose.msra.mxu1 %v4700_v33  ;;  %v5786_v63 = vld [vmem:[#allocation7_spill] sm:$0xff] }
 0x3ec   :  { %3830 = vmatprep.subr.mxu0 %v5698_v10  ;;  %3869 = vmatprep.subr.mxu1 %v5698_v10 }
 0x3ef   :  { %3831 = vmatpush3.xpose.msra.mxu0 %v4713_v58  ;;  %3870 = vmatpush3.xpose.msra.mxu1 %v4710_v34 }
 0x3f0   :  { %3832 = vmatprep.subr.mxu0 %v5698_v10  ;;  %3871 = vmatprep.subr.mxu1 %v5698_v10 }
 0x3f3   :  { %3833 = vmatpush3.xpose.msra.mxu0 %v4716_v20  ;;  %3872 = vmatpush3.xpose.msra.mxu1 %v4757_v54  ;;  %v5783_v20 = vld [vmem:[#allocation96_spill] sm:$0xff] }
 0x3f4   :  { %3834 = vmatprep.subr.mxu0 %v5698_v10  ;;  %3873 = vmatprep.subr.mxu1 %v5698_v10 }
 0x3f7   :  { %3835 = vmatpush3.xpose.msra.mxu0 %v4722_v38  ;;  %3874 = vmatpush3.xpose.msra.mxu1 %v4773_v13 }
 0x3f8   :  { %3836 = vmatprep.subr.mxu0 %v5698_v10  ;;  %3875 = vmatprep.subr.mxu1 %v5698_v10 }
 0x3fb   :  { %3837 = vmatpush3.xpose.msra.mxu0 %v4764_v29  ;;  %3876 = vmatpush3.xpose.msra.mxu1 %v4791_v46 }
 0x3fc   :  { %3838 = vmatprep.subr.mxu0 %v5698_v10  ;;  %3877 = vmatprep.subr.mxu1 %v5698_v10 }
 0x3ff   :  { %3839 = vmatpush3.xpose.msra.mxu0 %v5783_v20  ;;  %3878 = vmatpush3.xpose.msra.mxu1 %v4809_v7 }
 0x400   :  { %3840 = vmatprep.subr.mxu0 %v5698_v10  ;;  %3917 = vmatprep.subr.mxu1 %v5698_v10 }
 0x402   :  { %3880 = vmatmul.mubr.f32.vlgmr.msra.gmra.mxu1 %v2110_v15 }
 0x403   :  { %3841 = vmatpush3.xpose.msra.mxu0 %v5784_v25  ;;  %3918 = vmatpush3.xpose.msra.mxu1 %v4543_v28  ;;  %v5787_v28 = vld [vmem:[#allocation82_spill] sm:$0xff] }
 0x404   :  { %3842 = vmatprep.subr.mxu0 %v5698_v10  ;;  %3919 = vmatprep.subr.mxu1 %v5698_v10 }
 0x405   :  { %3949 = vmatprep.mubr.msk.f32.mxu1 %vm3985_vm0, %v5698_v10 }
 0x407   :  { %3843 = vmatpush3.xpose.msra.mxu0 %v5785_v35  ;;  %3920 = vmatpush3.xpose.msra.mxu1 %v4552_v39  ;;  %v5788_v39 = vld [vmem:[#allocation83_spill] sm:$0xff] }
 0x408   :  { %3882 = vmatprep.subr.mxu0 %v5698_v10  ;;  %3921 = vmatprep.subr.mxu1 %v5698_v10 }
 0x40a   :  { %3845 = vmatmul.mubr.f32.vlgmr.msra.gmra.mxu0 %v5280_v8 }
 0x40b   :  { %3883 = vmatpush3.xpose.msra.mxu0 %v5786_v63  ;;  %3922 = vmatpush3.xpose.msra.mxu1 %v4554_v48  ;;  %v5789_v48 = vld [vmem:[#allocation86_spill] sm:$0xff] }
 0x40c   :  { %3884 = vmatprep.subr.mxu0 %v5698_v10  ;;  %3923 = vmatprep.subr.mxu1 %v5698_v10 }
 0x40d   :  { %3914 = vmatprep.mubr.msk.f32.mxu0 %vm3985_vm0, %v5698_v10 }
 0x40f   :  { %3885 = vmatpush3.xpose.msra.mxu0 %v5787_v28  ;;  %3924 = vmatpush3.xpose.msra.mxu1 %v4561_v1  ;;  %v5798_v1 = vld [vmem:[#allocation50_spill] sm:$0xff] }
 0x410   :  { %3886 = vmatprep.subr.mxu0 %v5698_v10  ;;  %3925 = vmatprep.subr.mxu1 %v5698_v10 }
 0x413   :  { %3887 = vmatpush3.xpose.msra.mxu0 %v5788_v39  ;;  %3926 = vmatpush3.xpose.msra.mxu1 %v4613_v41  ;;  %v5791_v41 = vld [vmem:[#allocation88_spill] sm:$0xff] }
 0x414   :  { %3888 = vmatprep.subr.mxu0 %v5698_v10  ;;  %3927 = vmatprep.subr.mxu1 %v5698_v10 }
 0x417   :  { %3889 = vmatpush3.xpose.msra.mxu0 %v5789_v48  ;;  %3928 = vmatpush3.xpose.msra.mxu1 %v4629_v26  ;;  %v5792_v26 = vld [vmem:[#allocation89_spill] sm:$0xff] }
 0x418   :  { %3890 = vmatprep.subr.mxu0 %v5698_v10  ;;  %3929 = vmatprep.subr.mxu1 %v5698_v10 }
 0x41b   :  { %3891 = vmatpush3.xpose.msra.mxu0 %v5790_v0  ;;  %3930 = vmatpush3.xpose.msra.mxu1 %v4647_v21  ;;  %v5793_v21 = vld [vmem:[#allocation90_spill] sm:$0xff] }
 0x41c   :  { %3892 = vmatprep.subr.mxu0 %v5698_v10  ;;  %3931 = vmatprep.subr.mxu1 %v5698_v10 }
 0x41f   :  { %3893 = vmatpush3.xpose.msra.mxu0 %v5791_v41  ;;  %3932 = vmatpush3.xpose.msra.mxu1 %v4665_v49  ;;  %v5794_v49 = vld [vmem:[#allocation34_spill] sm:$0xff] }
 0x420   :  { %3894 = vmatprep.subr.mxu0 %v5698_v10  ;;  %3933 = vmatprep.subr.mxu1 %v5698_v10 }
 0x423   :  { %3895 = vmatpush3.xpose.msra.mxu0 %v5792_v26  ;;  %3934 = vmatpush3.xpose.msra.mxu1 %v4683_v60  ;;  %v5795_v60 = vld [vmem:[#allocation39_spill] sm:$0xff] }
 0x424   :  { %3896 = vmatprep.subr.mxu0 %v5698_v10  ;;  %3935 = vmatprep.subr.mxu1 %v5698_v10 }
 0x427   :  { %3897 = vmatpush3.xpose.msra.mxu0 %v5793_v21  ;;  %3936 = vmatpush3.xpose.msra.mxu1 %v4697_v43  ;;  %v5796_v43 = vld [vmem:[#allocation91_spill] sm:$0xff] }
 0x428   :  { %3898 = vmatprep.subr.mxu0 %v5698_v10  ;;  %3937 = vmatprep.subr.mxu1 %v5698_v10 }
 0x42b   :  { %3899 = vmatpush3.xpose.msra.mxu0 %v5794_v49  ;;  %3938 = vmatpush3.xpose.msra.mxu1 %v4700_v33  ;;  %v5797_v33 = vld [vmem:[#allocation93_spill] sm:$0xff] }
 0x42c   :  { %3900 = vmatprep.subr.mxu0 %v5698_v10  ;;  %3939 = vmatprep.subr.mxu1 %v5698_v10 }
 0x42f   :  { %3901 = vmatpush3.xpose.msra.mxu0 %v5795_v60  ;;  %3940 = vmatpush3.xpose.msra.mxu1 %v4710_v34 }
 0x430   :  { %3902 = vmatprep.subr.mxu0 %v5698_v10  ;;  %3941 = vmatprep.subr.mxu1 %v5698_v10 }
 0x433   :  { %3903 = vmatpush3.xpose.msra.mxu0 %v5796_v43  ;;  %3942 = vmatpush3.xpose.msra.mxu1 %v4757_v54 }
 0x434   :  { %3904 = vmatprep.subr.mxu0 %v5698_v10  ;;  %3943 = vmatprep.subr.mxu1 %v5698_v10 }
 0x437   :  { %3905 = vmatpush3.xpose.msra.mxu0 %v5797_v33  ;;  %3944 = vmatpush3.xpose.msra.mxu1 %v4773_v13  ;;  %v5800_v13 = vld [vmem:[#allocation99_spill] sm:$0xff] }
 0x438   :  { %3906 = vmatprep.subr.mxu0 %v5698_v10  ;;  %3945 = vmatprep.subr.mxu1 %v5698_v10 }
 0x43b   :  { %3907 = vmatpush3.xpose.msra.mxu0 %v5798_v1  ;;  %3946 = vmatpush3.xpose.msra.mxu1 %v4791_v46 }
 0x43c   :  { %3908 = vmatprep.subr.mxu0 %v5698_v10  ;;  %3947 = vmatprep.subr.mxu1 %v5698_v10 }
 0x43f   :  { %3909 = vmatpush3.xpose.msra.mxu0 %v5799_v5  ;;  %3948 = vmatpush3.xpose.msra.mxu1 %v4809_v7 }
 0x440   :  { %3910 = vmatprep.subr.mxu0 %v5698_v10 }
 0x442   :  { %3950 = vmatmul.mubr.f32.vlgmr.msra.gmra.mxu1 %v5277_v47 }
 0x443   :  { %3911 = vmatpush3.xpose.msra.mxu0 %v5800_v13 }
 0x444   :  { %3912 = vmatprep.subr.mxu0 %v5698_v10 }
 0x447   :  { %3913 = vmatpush3.xpose.msra.mxu0 %v5801_v6 }
 0x44a   :  { %3915 = vmatmul.mubr.f32.vlgmr.msra.gmra.mxu0 %v5277_v47 }
 0x482   :  { %v2265_v46 = vpop.f32.mrf.mxu1 }
 0x484   :  { %v3811_v62 = vpop.f32.mrf.mxu1 }
 0x48a   :  { %v2114_v56 = vpop.f32.mrf.mxu0 }
 0x48b   :  { %v2266_v36 = vadd.f32 %v2265_v46, %v2114_v56 }
 0x48c   :  { %v3776_v34 = vpop.f32.mrf.mxu0 }
 0x4c2   :  { %v2458_v58 = vpop.f32.mrf.mxu1 }
 0x4c4   :  { %v3881_v38 = vpop.f32.mrf.mxu1 }
 0x4ca   :  { %v2369_v7 = vpop.f32.mrf.mxu0 }
 0x4cb   :  { %v2370_v54 = vadd.f32 %v2369_v7, %v2266_v36 }
 0x4cc   :  { %v3846_v29 = vpop.f32.mrf.mxu0 }
 0x4cd   :  { %v2459_v24 = vadd.f32 %v2458_v58, %v2370_v54 }
 0x502   :  { %v2664_v52 = vpop.f32.mrf.mxu1 }
 0x504   :  { %v3951_v12 = vpop.f32.mrf.mxu1 }
 0x50a   :  { %v2577_v14 = vpop.f32.mrf.mxu0 }
 0x50b   :  { %v2578_v55 = vadd.f32 %v2577_v14, %v2459_v24 }
 0x50c   :  { %v3916_v10 = vpop.f32.mrf.mxu0 }
 0x50d   :  { %v2665_v51 = vadd.f32 %v2664_v52, %v2578_v55 }
 0x50f   :  { %v2669_v2 = vmul.f32 %v2665_v51, %v5057_v9 }
 0x511   :  { %v2676_v30 = vmul.f32 %v2702_v3, %v2669_v2 }
 0x513   :  { %v2684_v44 = vadd.f32 %v2703_v27, %v2676_v30 }
 0x515   :  { %2685 = vst [vmem:[#allocation2] sm:$0xff] %v2684_v44 }
 0x516   :  { %2690 = vsyncadd [#allocation3], 64  ;;  %s3986_s27 = smov [#allocation2]  }
 0x517   :  { %s2691_s28 = sshll.u32 %s3986_s27, 4  ;;  %s2692_s28 = int_to_ptr.vmem [resolvable:$true] %s2691_s28 }
 0x518   :  { %s3962_s29 = scalar_lea.vmem %s2692_s28, 64  ;;  %s3966_s30 = scalar_lea.vmem %s2692_s28, 128 }
 0x519   :  { %p3963_p0 = scmp.ne.s32.totalorder %s2692_s28, %s3962_s29  ;;  %p3967_p1 = scmp.lt.s32.totalorder %s2692_s28, %s2692_s28 }
 0x51a   :  { %p3968_p2 = scmp.lt.s32.totalorder %s3966_s30, %s3962_s29 }
 0x51c   :  { %p3969_p3 = por %p3968_p2, %p3967_p1 }
 0x51e   :  { %p3970_p4 = pnand %p3969_p3, %p3963_p0 }
 0x520   :  { %3973 = shalt.err (!%p3970_p4)
}
 0x521   :  { %s3987_s1 = smov 64   ;;  %s3988_s5 = smov 4  }
 0x522   :  { %2697 = dma.vmem_to_hbm [thread:$0]  %s2692_s28, 64, %s5436_s4, [#allocation3], %s3987_s1, %s3987_s1, %s3988_s5  }
 0x523   :  { %3982 = dma.done.wait [#allocation3], 128  }
 0x524   :  { %3983 = vsyncadd [#allocation3], 4294967168 }
 0x525   :  { %2701 = vsyncpa [#allocation3], 1 }

</bundles_post_ra>
